<compile_context>
chip_gen: v7x
topology: tpu7x:2x2x1
jax: 0.10.0
libtpu: 0.0.40
codegen_flags: <defaults>
</compile_context>

<pallas_src>
import functools

import jax
import jax.numpy as jnp
from jax import lax
from jax.experimental import pallas as pl
from jax.experimental.pallas import tpu as pltpu

_SIGN_FIX = 0x7FFFFFFF  # xor-mask making int32 float-bit keys order-preserving


def _channel_attention_kernel(x_ref, w1t_ref, b1_ref, w2t_ref, b2_ref, o_ref,
                              *, key_shift, n_iters):
    # x_ref  : (Bb, C, HW) input dtype (f32 or bf16); C on sublanes, HW on lanes.
    # w1t_ref: (C, I) f32   fc1 weight, pre-transposed
    # b1_ref : (1, I) f32
    # w2t_ref: (I, C) f32   fc2 weight, pre-transposed
    # b2_ref : (1, C) f32
    # o_ref  : (1, Bb, C) f32  lane-dense output block
    xf = x_ref[...].astype(jnp.float32)          # in-kernel cast (free: VALU-bound)
    Bb, C, HW = xf.shape

    # ---- global average / max pooling: lane reductions over HW ----
    avg = jnp.mean(xf, axis=-1)                  # (Bb, C)
    mx = jnp.max(xf, axis=-1)                    # (Bb, C)

    # ---- global lower-median pooling via value bisection on int keys ----
    # f32 -> int32 keys whose signed order equals float order.
    sign_fix = jnp.int32(_SIGN_FIX)
    bits = pltpu.bitcast(xf, jnp.int32)          # (Bb, C, HW)
    keys = jnp.where(bits >= 0, bits, bits ^ sign_fix)
    if key_shift:
        # bf16 inputs: only the top 16 key bits vary -> bisect 16-bit keys.
        keys = keys >> key_shift
        lo0 = jnp.full((Bb, C), -(1 << (31 - key_shift)), jnp.int32)
        hi0 = jnp.full((Bb, C), (1 << (31 - key_shift)) - 1, jnp.int32)
    else:
        lo0 = jnp.full((Bb, C), jnp.iinfo(jnp.int32).min, jnp.int32)
        hi0 = jnp.full((Bb, C), jnp.iinfo(jnp.int32).max, jnp.int32)
    k1 = (HW - 1) // 2 + 1                       # 1-based rank of the lower median

    def bisect(_, carry):
        lo, hi = carry                           # (Bb, C) int32 each
        mid = (lo & hi) + ((lo ^ hi) >> 1)       # overflow-free floor((lo+hi)/2)
        cnt = jnp.sum(keys <= mid[:, :, None], axis=-1, dtype=jnp.int32)
        in_low = cnt >= k1                       # median key <= mid ?
        return jnp.where(in_low, lo, mid + 1), jnp.where(in_low, mid, hi)

    med_key, _ = lax.fori_loop(0, n_iters, bisect, (lo0, hi0), unroll=True)
    if key_shift:
        low_fill = jnp.where(med_key < 0,
                             jnp.int32((1 << key_shift) - 1), jnp.int32(0))
        med_key = (med_key << key_shift) | low_fill
    med_bits = jnp.where(med_key >= 0, med_key, med_key ^ sign_fix)
    med = pltpu.bitcast(med_bits, jnp.float32)   # (Bb, C) exact lower median

    # ---- fused 2-layer bottleneck (1x1 convs == dense over channels) ----
    pooled = jnp.concatenate([avg, mx, med], axis=0)                       # (3Bb, C)
    h = jnp.maximum(
        jnp.dot(pooled, w1t_ref[...], preferred_element_type=jnp.float32)
        + b1_ref[...], 0.0)                                                # (3Bb, I)
    hsum = h[0:Bb] + h[Bb:2 * Bb] + h[2 * Bb:3 * Bb]                       # (Bb, I)
    # fc2 is linear: fc2(a)+fc2(b)+fc2(c) = w2 @ (ha+hb+hc) + 3*b2
    out = (jnp.dot(hsum, w2t_ref[...], preferred_element_type=jnp.float32)
           + 3.0 * b2_ref[...])                                            # (Bb, C)
    o_ref[...] = jax.nn.sigmoid(out).reshape(1, Bb, C)


def _pick_batch_block(B, C, HW, itemsize):
    """Batch block size: amortize per-step pipeline overhead, stay under VMEM."""
    budget = 8 * 1024 * 1024                     # x double-buffer + keys + mask temp
    per_b = C * HW * (2 * itemsize + 8)
    bb = max(1, min(8, budget // max(per_b, 1)))
    if B >= 2:
        bb = min(bb, max(1, B // 2))             # keep >=2 grid steps (v7x megacore)
    bb = min(bb, B)
    while B % bb:                                # require even division of B
        bb -= 1
    return bb


def channel_attention(x, w1, b1, w2, b2):
    """x: (B, C, H, W) NCHW (f32 or bf16).  w1: (I, C), b1: (I,), w2: (C, I), b2: (C,).
    Returns (B, C, 1, 1) float32, matching the PyTorch module."""
    B, C, H, W = x.shape
    HW = H * W
    I = w1.shape[0]
    x_flat = x.reshape(B, C, HW)                 # free view, native dtype (no HBM copy)
    key_shift, n_iters = (16, 16) if x.dtype == jnp.bfloat16 else (0, 32)
    bb = _pick_batch_block(B, C, HW, x.dtype.itemsize)

    kernel = functools.partial(_channel_attention_kernel,
                               key_shift=key_shift, n_iters=n_iters)
    out = pl.pallas_call(
        kernel,
        out_shape=jax.ShapeDtypeStruct((B // bb, bb, C), jnp.float32),
        grid_spec=pltpu.PrefetchScalarGridSpec(
            num_scalar_prefetch=0,
            grid=(B // bb,),
            in_specs=[
                pl.BlockSpec((bb, C, HW), lambda b: (b, 0, 0)),  # Bb feature maps/step
                pl.BlockSpec((C, I), lambda b: (0, 0)),
                pl.BlockSpec((1, I), lambda b: (0, 0)),
                pl.BlockSpec((I, C), lambda b: (0, 0)),
                pl.BlockSpec((1, C), lambda b: (0, 0)),
            ],
            out_specs=pl.BlockSpec((1, bb, C), lambda b: (b, 0, 0)),  # lane-dense
        ),
        compiler_params=pltpu.CompilerParams(
            dimension_semantics=("parallel",)),   # shard batch blocks across TCs
    )(x_flat,
      jnp.asarray(w1, jnp.float32).T,            # (C, I)
      jnp.asarray(b1, jnp.float32).reshape(1, I),
      jnp.asarray(w2, jnp.float32).T,            # (I, C)
      jnp.asarray(b2, jnp.float32).reshape(1, C))

    return out.reshape(B, C, 1, 1)


def channel_attention_ref(x, w1, b1, w2, b2):
    """Pure-JAX reference mirroring the PyTorch forward exactly."""
    B, C, H, W = x.shape
    xf = x.astype(jnp.float32).reshape(B, C, H * W)
    avg = xf.mean(axis=-1)
    mx = xf.max(axis=-1)
    med = jnp.sort(xf, axis=-1)[..., (H * W - 1) // 2]   # torch.median = lower median

    def mlp(p):
        h = jnp.maximum(p @ w1.T + b1, 0.0)
        return h @ w2.T + b2

    out = jax.nn.sigmoid(mlp(avg) + mlp(mx) + mlp(med))
    return out.reshape(B, C, 1, 1)


if __name__ == "__main__":
    B, C, H, W = 2, 4, 16, 16          # input_channels = 4
    I = 8                              # internal_neurons = 8

    key = jax.random.PRNGKey(0)
    kx, k1, k2, k3, k4 = jax.random.split(key, 5)

    x = jax.random.normal(kx, (B, C, H, W), dtype=jnp.float32)
    # Deterministic synthetic parameters (Conv2d 1x1 weights squeezed to 2-D).
    w1 = jax.random.normal(k1, (I, C), dtype=jnp.float32) * 0.1   # fc1.weight
    b1 = jax.random.normal(k2, (I,), dtype=jnp.float32) * 0.1     # fc1.bias
    w2 = jax.random.normal(k3, (C, I), dtype=jnp.float32) * 0.1   # fc2.weight
    b2 = jax.random.normal(k4, (C,), dtype=jnp.float32) * 0.1     # fc2.bias

    # float32 path (32-iteration bisection)
    out = jax.block_until_ready(channel_attention(x, w1, b1, w2, b2))
    ref = channel_attention_ref(x, w1, b1, w2, b2)
    assert out.shape == (B, C, 1, 1)
    assert jnp.allclose(out, ref, atol=1e-5, rtol=1e-5), (out, ref)

    # bfloat16 path (16-bit keys, 16-iteration bisection, half the HBM bytes)
    x_bf = x.astype(jnp.bfloat16)
    out_bf = jax.block_until_ready(channel_attention(x_bf, w1, b1, w2, b2))
    ref_bf = channel_attention_ref(x_bf, w1, b1, w2, b2)
    assert jnp.allclose(out_bf, ref_bf, atol=1e-4, rtol=1e-4), (out_bf, ref_bf)

    print("KERNEL_OK")
</pallas_src>

<mosaic_0001>
module attributes {stable_mosaic.version = 11 : i64} {
  func.func @_channel_attention_kernel(%arg0: i32, %arg1: memref<1x4x256xf32, #tpu.memory_space<vmem>>, %arg2: memref<4x8xf32, #tpu.memory_space<vmem>>, %arg3: memref<1x8xf32, #tpu.memory_space<vmem>>, %arg4: memref<8x4xf32, #tpu.memory_space<vmem>>, %arg5: memref<1x4xf32, #tpu.memory_space<vmem>>, %arg6: memref<1x1x4xf32, #tpu.memory_space<vmem>>) attributes {dimension_semantics = [#tpu.dimension_semantics<parallel>], iteration_bounds = array<i64: 2>, scalar_prefetch = 0 : i64, scratch_operands = 0 : i64, tpu.core_type = #tpu.core_type<tc>, window_params = [{transform_indices = @transform_0, window_bounds = array<i64: 1, 4, 256>}, {pipeline_mode = #tpu.pipeline_mode<synchronous>, transform_indices = @transform_1, window_bounds = array<i64: 4, 8>}, {pipeline_mode = #tpu.pipeline_mode<synchronous>, transform_indices = @transform_2, window_bounds = array<i64: 1, 8>}, {pipeline_mode = #tpu.pipeline_mode<synchronous>, transform_indices = @transform_3, window_bounds = array<i64: 8, 4>}, {pipeline_mode = #tpu.pipeline_mode<synchronous>, transform_indices = @transform_4, window_bounds = array<i64: 1, 4>}, {transform_indices = @transform_5, window_bounds = array<i64: 1, 1, 4>}]} {
    %c0 = arith.constant 0 : index
    %c0_0 = arith.constant 0 : index
    %c0_1 = arith.constant 0 : index
    %0 = vector.load %arg1[%c0, %c0_0, %c0_1] : memref<1x4x256xf32, #tpu.memory_space<vmem>>, vector<1x4x256xf32>
    %cst = arith.constant dense<0.000000e+00> : vector<1x4xf32>
    %1 = vector.multi_reduction <add>, %0, %cst [2] : vector<1x4x256xf32> to vector<1x4xf32>
    %cst_2 = arith.constant 2.560000e+02 : f32
    %2 = vector.broadcast %cst_2 : f32 to vector<1x4xf32>
    %3 = arith.divf %1, %2 : vector<1x4xf32>
    %cst_3 = arith.constant dense<0xFF800000> : vector<1x4xf32>
    %4 = vector.multi_reduction <maximumf>, %0, %cst_3 [2] : vector<1x4x256xf32> to vector<1x4xf32>
    %5 = tpu.bitcast %0 : vector<1x4x256xf32> -> vector<1x4x256xi32>
    %c0_i32 = arith.constant 0 : i32
    %6 = vector.broadcast %c0_i32 : i32 to vector<1x4x256xi32>
    %7 = arith.cmpi sge, %5, %6 : vector<1x4x256xi32>
    %c2147483647_i32 = arith.constant 2147483647 : i32
    %8 = vector.broadcast %c2147483647_i32 : i32 to vector<1x4x256xi32>
    %9 = arith.xori %5, %8 : vector<1x4x256xi32>
    %10 = arith.select %7, %5, %9 : vector<1x4x256xi1>, vector<1x4x256xi32>
    %c-2147483648_i32 = arith.constant -2147483648 : i32
    %11 = vector.broadcast %c-2147483648_i32 : i32 to vector<1x4xi32>
    %c2147483647_i32_4 = arith.constant 2147483647 : i32
    %12 = vector.broadcast %c2147483647_i32_4 : i32 to vector<1x4xi32>
    %c0_i32_5 = arith.constant 0 : i32
    %13 = arith.andi %11, %12 : vector<1x4xi32>
    %14 = arith.xori %11, %12 : vector<1x4xi32>
    %c1_i32 = arith.constant 1 : i32
    %15 = vector.broadcast %c1_i32 : i32 to vector<1x4xi32>
    %16 = arith.shrsi %14, %15 : vector<1x4xi32>
    %17 = arith.addi %13, %16 : vector<1x4xi32>
    %18 = vector.shape_cast %17 : vector<1x4xi32> to vector<1x4x1xi32>
    %19 = vector.broadcast %18 : vector<1x4x1xi32> to vector<1x4x256xi32>
    %20 = arith.cmpi sle, %10, %19 : vector<1x4x256xi32>
    %21 = arith.extui %20 : vector<1x4x256xi1> to vector<1x4x256xi32>
    %cst_6 = arith.constant dense<0> : vector<1x4xi32>
    %22 = vector.multi_reduction <add>, %21, %cst_6 [2] : vector<1x4x256xi32> to vector<1x4xi32>
    %c128_i32 = arith.constant 128 : i32
    %23 = vector.broadcast %c128_i32 : i32 to vector<1x4xi32>
    %24 = arith.cmpi sge, %22, %23 : vector<1x4xi32>
    %c1_i32_7 = arith.constant 1 : i32
    %25 = vector.broadcast %c1_i32_7 : i32 to vector<1x4xi32>
    %26 = arith.addi %17, %25 : vector<1x4xi32>
    %27 = arith.select %24, %11, %26 : vector<1x4xi1>, vector<1x4xi32>
    %28 = arith.select %24, %17, %12 : vector<1x4xi1>, vector<1x4xi32>
    %c1_i32_8 = arith.constant 1 : i32
    %29 = arith.andi %27, %28 : vector<1x4xi32>
    %30 = arith.xori %27, %28 : vector<1x4xi32>
    %c1_i32_9 = arith.constant 1 : i32
    %31 = vector.broadcast %c1_i32_9 : i32 to vector<1x4xi32>
    %32 = arith.shrsi %30, %31 : vector<1x4xi32>
    %33 = arith.addi %29, %32 : vector<1x4xi32>
    %34 = vector.shape_cast %33 : vector<1x4xi32> to vector<1x4x1xi32>
    %35 = vector.broadcast %34 : vector<1x4x1xi32> to vector<1x4x256xi32>
    %36 = arith.cmpi sle, %10, %35 : vector<1x4x256xi32>
    %37 = arith.extui %36 : vector<1x4x256xi1> to vector<1x4x256xi32>
    %cst_10 = arith.constant dense<0> : vector<1x4xi32>
    %38 = vector.multi_reduction <add>, %37, %cst_10 [2] : vector<1x4x256xi32> to vector<1x4xi32>
    %c128_i32_11 = arith.constant 128 : i32
    %39 = vector.broadcast %c128_i32_11 : i32 to vector<1x4xi32>
    %40 = arith.cmpi sge, %38, %39 : vector<1x4xi32>
    %c1_i32_12 = arith.constant 1 : i32
    %41 = vector.broadcast %c1_i32_12 : i32 to vector<1x4xi32>
    %42 = arith.addi %33, %41 : vector<1x4xi32>
    %43 = arith.select %40, %27, %42 : vector<1x4xi1>, vector<1x4xi32>
    %44 = arith.select %40, %33, %28 : vector<1x4xi1>, vector<1x4xi32>
    %c2_i32 = arith.constant 2 : i32
    %45 = arith.andi %43, %44 : vector<1x4xi32>
    %46 = arith.xori %43, %44 : vector<1x4xi32>
    %c1_i32_13 = arith.constant 1 : i32
    %47 = vector.broadcast %c1_i32_13 : i32 to vector<1x4xi32>
    %48 = arith.shrsi %46, %47 : vector<1x4xi32>
    %49 = arith.addi %45, %48 : vector<1x4xi32>
    %50 = vector.shape_cast %49 : vector<1x4xi32> to vector<1x4x1xi32>
    %51 = vector.broadcast %50 : vector<1x4x1xi32> to vector<1x4x256xi32>
    %52 = arith.cmpi sle, %10, %51 : vector<1x4x256xi32>
    %53 = arith.extui %52 : vector<1x4x256xi1> to vector<1x4x256xi32>
    %cst_14 = arith.constant dense<0> : vector<1x4xi32>
    %54 = vector.multi_reduction <add>, %53, %cst_14 [2] : vector<1x4x256xi32> to vector<1x4xi32>
    %c128_i32_15 = arith.constant 128 : i32
    %55 = vector.broadcast %c128_i32_15 : i32 to vector<1x4xi32>
    %56 = arith.cmpi sge, %54, %55 : vector<1x4xi32>
    %c1_i32_16 = arith.constant 1 : i32
    %57 = vector.broadcast %c1_i32_16 : i32 to vector<1x4xi32>
    %58 = arith.addi %49, %57 : vector<1x4xi32>
    %59 = arith.select %56, %43, %58 : vector<1x4xi1>, vector<1x4xi32>
    %60 = arith.select %56, %49, %44 : vector<1x4xi1>, vector<1x4xi32>
    %c3_i32 = arith.constant 3 : i32
    %61 = arith.andi %59, %60 : vector<1x4xi32>
    %62 = arith.xori %59, %60 : vector<1x4xi32>
    %c1_i32_17 = arith.constant 1 : i32
    %63 = vector.broadcast %c1_i32_17 : i32 to vector<1x4xi32>
    %64 = arith.shrsi %62, %63 : vector<1x4xi32>
    %65 = arith.addi %61, %64 : vector<1x4xi32>
    %66 = vector.shape_cast %65 : vector<1x4xi32> to vector<1x4x1xi32>
    %67 = vector.broadcast %66 : vector<1x4x1xi32> to vector<1x4x256xi32>
    %68 = arith.cmpi sle, %10, %67 : vector<1x4x256xi32>
    %69 = arith.extui %68 : vector<1x4x256xi1> to vector<1x4x256xi32>
    %cst_18 = arith.constant dense<0> : vector<1x4xi32>
    %70 = vector.multi_reduction <add>, %69, %cst_18 [2] : vector<1x4x256xi32> to vector<1x4xi32>
    %c128_i32_19 = arith.constant 128 : i32
    %71 = vector.broadcast %c128_i32_19 : i32 to vector<1x4xi32>
    %72 = arith.cmpi sge, %70, %71 : vector<1x4xi32>
    %c1_i32_20 = arith.constant 1 : i32
    %73 = vector.broadcast %c1_i32_20 : i32 to vector<1x4xi32>
    %74 = arith.addi %65, %73 : vector<1x4xi32>
    %75 = arith.select %72, %59, %74 : vector<1x4xi1>, vector<1x4xi32>
    %76 = arith.select %72, %65, %60 : vector<1x4xi1>, vector<1x4xi32>
    %c4_i32 = arith.constant 4 : i32
    %77 = arith.andi %75, %76 : vector<1x4xi32>
    %78 = arith.xori %75, %76 : vector<1x4xi32>
    %c1_i32_21 = arith.constant 1 : i32
    %79 = vector.broadcast %c1_i32_21 : i32 to vector<1x4xi32>
    %80 = arith.shrsi %78, %79 : vector<1x4xi32>
    %81 = arith.addi %77, %80 : vector<1x4xi32>
    %82 = vector.shape_cast %81 : vector<1x4xi32> to vector<1x4x1xi32>
    %83 = vector.broadcast %82 : vector<1x4x1xi32> to vector<1x4x256xi32>
    %84 = arith.cmpi sle, %10, %83 : vector<1x4x256xi32>
    %85 = arith.extui %84 : vector<1x4x256xi1> to vector<1x4x256xi32>
    %cst_22 = arith.constant dense<0> : vector<1x4xi32>
    %86 = vector.multi_reduction <add>, %85, %cst_22 [2] : vector<1x4x256xi32> to vector<1x4xi32>
    %c128_i32_23 = arith.constant 128 : i32
    %87 = vector.broadcast %c128_i32_23 : i32 to vector<1x4xi32>
    %88 = arith.cmpi sge, %86, %87 : vector<1x4xi32>
    %c1_i32_24 = arith.constant 1 : i32
    %89 = vector.broadcast %c1_i32_24 : i32 to vector<1x4xi32>
    %90 = arith.addi %81, %89 : vector<1x4xi32>
    %91 = arith.select %88, %75, %90 : vector<1x4xi1>, vector<1x4xi32>
    %92 = arith.select %88, %81, %76 : vector<1x4xi1>, vector<1x4xi32>
    %c5_i32 = arith.constant 5 : i32
    %93 = arith.andi %91, %92 : vector<1x4xi32>
    %94 = arith.xori %91, %92 : vector<1x4xi32>
    %c1_i32_25 = arith.constant 1 : i32
    %95 = vector.broadcast %c1_i32_25 : i32 to vector<1x4xi32>
    %96 = arith.shrsi %94, %95 : vector<1x4xi32>
    %97 = arith.addi %93, %96 : vector<1x4xi32>
    %98 = vector.shape_cast %97 : vector<1x4xi32> to vector<1x4x1xi32>
    %99 = vector.broadcast %98 : vector<1x4x1xi32> to vector<1x4x256xi32>
    %100 = arith.cmpi sle, %10, %99 : vector<1x4x256xi32>
    %101 = arith.extui %100 : vector<1x4x256xi1> to vector<1x4x256xi32>
    %cst_26 = arith.constant dense<0> : vector<1x4xi32>
    %102 = vector.multi_reduction <add>, %101, %cst_26 [2] : vector<1x4x256xi32> to vector<1x4xi32>
    %c128_i32_27 = arith.constant 128 : i32
    %103 = vector.broadcast %c128_i32_27 : i32 to vector<1x4xi32>
    %104 = arith.cmpi sge, %102, %103 : vector<1x4xi32>
    %c1_i32_28 = arith.constant 1 : i32
    %105 = vector.broadcast %c1_i32_28 : i32 to vector<1x4xi32>
    %106 = arith.addi %97, %105 : vector<1x4xi32>
    %107 = arith.select %104, %91, %106 : vector<1x4xi1>, vector<1x4xi32>
    %108 = arith.select %104, %97, %92 : vector<1x4xi1>, vector<1x4xi32>
    %c6_i32 = arith.constant 6 : i32
    %109 = arith.andi %107, %108 : vector<1x4xi32>
    %110 = arith.xori %107, %108 : vector<1x4xi32>
    %c1_i32_29 = arith.constant 1 : i32
    %111 = vector.broadcast %c1_i32_29 : i32 to vector<1x4xi32>
    %112 = arith.shrsi %110, %111 : vector<1x4xi32>
    %113 = arith.addi %109, %112 : vector<1x4xi32>
    %114 = vector.shape_cast %113 : vector<1x4xi32> to vector<1x4x1xi32>
    %115 = vector.broadcast %114 : vector<1x4x1xi32> to vector<1x4x256xi32>
    %116 = arith.cmpi sle, %10, %115 : vector<1x4x256xi32>
    %117 = arith.extui %116 : vector<1x4x256xi1> to vector<1x4x256xi32>
    %cst_30 = arith.constant dense<0> : vector<1x4xi32>
    %118 = vector.multi_reduction <add>, %117, %cst_30 [2] : vector<1x4x256xi32> to vector<1x4xi32>
    %c128_i32_31 = arith.constant 128 : i32
    %119 = vector.broadcast %c128_i32_31 : i32 to vector<1x4xi32>
    %120 = arith.cmpi sge, %118, %119 : vector<1x4xi32>
    %c1_i32_32 = arith.constant 1 : i32
    %121 = vector.broadcast %c1_i32_32 : i32 to vector<1x4xi32>
    %122 = arith.addi %113, %121 : vector<1x4xi32>
    %123 = arith.select %120, %107, %122 : vector<1x4xi1>, vector<1x4xi32>
    %124 = arith.select %120, %113, %108 : vector<1x4xi1>, vector<1x4xi32>
    %c7_i32 = arith.constant 7 : i32
    %125 = arith.andi %123, %124 : vector<1x4xi32>
    %126 = arith.xori %123, %124 : vector<1x4xi32>
    %c1_i32_33 = arith.constant 1 : i32
    %127 = vector.broadcast %c1_i32_33 : i32 to vector<1x4xi32>
    %128 = arith.shrsi %126, %127 : vector<1x4xi32>
    %129 = arith.addi %125, %128 : vector<1x4xi32>
    %130 = vector.shape_cast %129 : vector<1x4xi32> to vector<1x4x1xi32>
    %131 = vector.broadcast %130 : vector<1x4x1xi32> to vector<1x4x256xi32>
    %132 = arith.cmpi sle, %10, %131 : vector<1x4x256xi32>
    %133 = arith.extui %132 : vector<1x4x256xi1> to vector<1x4x256xi32>
    %cst_34 = arith.constant dense<0> : vector<1x4xi32>
    %134 = vector.multi_reduction <add>, %133, %cst_34 [2] : vector<1x4x256xi32> to vector<1x4xi32>
    %c128_i32_35 = arith.constant 128 : i32
    %135 = vector.broadcast %c128_i32_35 : i32 to vector<1x4xi32>
    %136 = arith.cmpi sge, %134, %135 : vector<1x4xi32>
    %c1_i32_36 = arith.constant 1 : i32
    %137 = vector.broadcast %c1_i32_36 : i32 to vector<1x4xi32>
    %138 = arith.addi %129, %137 : vector<1x4xi32>
    %139 = arith.select %136, %123, %138 : vector<1x4xi1>, vector<1x4xi32>
    %140 = arith.select %136, %129, %124 : vector<1x4xi1>, vector<1x4xi32>
    %c8_i32 = arith.constant 8 : i32
    %141 = arith.andi %139, %140 : vector<1x4xi32>
    %142 = arith.xori %139, %140 : vector<1x4xi32>
    %c1_i32_37 = arith.constant 1 : i32
    %143 = vector.broadcast %c1_i32_37 : i32 to vector<1x4xi32>
    %144 = arith.shrsi %142, %143 : vector<1x4xi32>
    %145 = arith.addi %141, %144 : vector<1x4xi32>
    %146 = vector.shape_cast %145 : vector<1x4xi32> to vector<1x4x1xi32>
    %147 = vector.broadcast %146 : vector<1x4x1xi32> to vector<1x4x256xi32>
    %148 = arith.cmpi sle, %10, %147 : vector<1x4x256xi32>
    %149 = arith.extui %148 : vector<1x4x256xi1> to vector<1x4x256xi32>
    %cst_38 = arith.constant dense<0> : vector<1x4xi32>
    %150 = vector.multi_reduction <add>, %149, %cst_38 [2] : vector<1x4x256xi32> to vector<1x4xi32>
    %c128_i32_39 = arith.constant 128 : i32
    %151 = vector.broadcast %c128_i32_39 : i32 to vector<1x4xi32>
    %152 = arith.cmpi sge, %150, %151 : vector<1x4xi32>
    %c1_i32_40 = arith.constant 1 : i32
    %153 = vector.broadcast %c1_i32_40 : i32 to vector<1x4xi32>
    %154 = arith.addi %145, %153 : vector<1x4xi32>
    %155 = arith.select %152, %139, %154 : vector<1x4xi1>, vector<1x4xi32>
    %156 = arith.select %152, %145, %140 : vector<1x4xi1>, vector<1x4xi32>
    %c9_i32 = arith.constant 9 : i32
    %157 = arith.andi %155, %156 : vector<1x4xi32>
    %158 = arith.xori %155, %156 : vector<1x4xi32>
    %c1_i32_41 = arith.constant 1 : i32
    %159 = vector.broadcast %c1_i32_41 : i32 to vector<1x4xi32>
    %160 = arith.shrsi %158, %159 : vector<1x4xi32>
    %161 = arith.addi %157, %160 : vector<1x4xi32>
    %162 = vector.shape_cast %161 : vector<1x4xi32> to vector<1x4x1xi32>
    %163 = vector.broadcast %162 : vector<1x4x1xi32> to vector<1x4x256xi32>
    %164 = arith.cmpi sle, %10, %163 : vector<1x4x256xi32>
    %165 = arith.extui %164 : vector<1x4x256xi1> to vector<1x4x256xi32>
    %cst_42 = arith.constant dense<0> : vector<1x4xi32>
    %166 = vector.multi_reduction <add>, %165, %cst_42 [2] : vector<1x4x256xi32> to vector<1x4xi32>
    %c128_i32_43 = arith.constant 128 : i32
    %167 = vector.broadcast %c128_i32_43 : i32 to vector<1x4xi32>
    %168 = arith.cmpi sge, %166, %167 : vector<1x4xi32>
    %c1_i32_44 = arith.constant 1 : i32
    %169 = vector.broadcast %c1_i32_44 : i32 to vector<1x4xi32>
    %170 = arith.addi %161, %169 : vector<1x4xi32>
    %171 = arith.select %168, %155, %170 : vector<1x4xi1>, vector<1x4xi32>
    %172 = arith.select %168, %161, %156 : vector<1x4xi1>, vector<1x4xi32>
    %c10_i32 = arith.constant 10 : i32
    %173 = arith.andi %171, %172 : vector<1x4xi32>
    %174 = arith.xori %171, %172 : vector<1x4xi32>
    %c1_i32_45 = arith.constant 1 : i32
    %175 = vector.broadcast %c1_i32_45 : i32 to vector<1x4xi32>
    %176 = arith.shrsi %174, %175 : vector<1x4xi32>
    %177 = arith.addi %173, %176 : vector<1x4xi32>
    %178 = vector.shape_cast %177 : vector<1x4xi32> to vector<1x4x1xi32>
    %179 = vector.broadcast %178 : vector<1x4x1xi32> to vector<1x4x256xi32>
    %180 = arith.cmpi sle, %10, %179 : vector<1x4x256xi32>
    %181 = arith.extui %180 : vector<1x4x256xi1> to vector<1x4x256xi32>
    %cst_46 = arith.constant dense<0> : vector<1x4xi32>
    %182 = vector.multi_reduction <add>, %181, %cst_46 [2] : vector<1x4x256xi32> to vector<1x4xi32>
    %c128_i32_47 = arith.constant 128 : i32
    %183 = vector.broadcast %c128_i32_47 : i32 to vector<1x4xi32>
    %184 = arith.cmpi sge, %182, %183 : vector<1x4xi32>
    %c1_i32_48 = arith.constant 1 : i32
    %185 = vector.broadcast %c1_i32_48 : i32 to vector<1x4xi32>
    %186 = arith.addi %177, %185 : vector<1x4xi32>
    %187 = arith.select %184, %171, %186 : vector<1x4xi1>, vector<1x4xi32>
    %188 = arith.select %184, %177, %172 : vector<1x4xi1>, vector<1x4xi32>
    %c11_i32 = arith.constant 11 : i32
    %189 = arith.andi %187, %188 : vector<1x4xi32>
    %190 = arith.xori %187, %188 : vector<1x4xi32>
    %c1_i32_49 = arith.constant 1 : i32
    %191 = vector.broadcast %c1_i32_49 : i32 to vector<1x4xi32>
    %192 = arith.shrsi %190, %191 : vector<1x4xi32>
    %193 = arith.addi %189, %192 : vector<1x4xi32>
    %194 = vector.shape_cast %193 : vector<1x4xi32> to vector<1x4x1xi32>
    %195 = vector.broadcast %194 : vector<1x4x1xi32> to vector<1x4x256xi32>
    %196 = arith.cmpi sle, %10, %195 : vector<1x4x256xi32>
    %197 = arith.extui %196 : vector<1x4x256xi1> to vector<1x4x256xi32>
    %cst_50 = arith.constant dense<0> : vector<1x4xi32>
    %198 = vector.multi_reduction <add>, %197, %cst_50 [2] : vector<1x4x256xi32> to vector<1x4xi32>
    %c128_i32_51 = arith.constant 128 : i32
    %199 = vector.broadcast %c128_i32_51 : i32 to vector<1x4xi32>
    %200 = arith.cmpi sge, %198, %199 : vector<1x4xi32>
    %c1_i32_52 = arith.constant 1 : i32
    %201 = vector.broadcast %c1_i32_52 : i32 to vector<1x4xi32>
    %202 = arith.addi %193, %201 : vector<1x4xi32>
    %203 = arith.select %200, %187, %202 : vector<1x4xi1>, vector<1x4xi32>
    %204 = arith.select %200, %193, %188 : vector<1x4xi1>, vector<1x4xi32>
    %c12_i32 = arith.constant 12 : i32
    %205 = arith.andi %203, %204 : vector<1x4xi32>
    %206 = arith.xori %203, %204 : vector<1x4xi32>
    %c1_i32_53 = arith.constant 1 : i32
    %207 = vector.broadcast %c1_i32_53 : i32 to vector<1x4xi32>
    %208 = arith.shrsi %206, %207 : vector<1x4xi32>
    %209 = arith.addi %205, %208 : vector<1x4xi32>
    %210 = vector.shape_cast %209 : vector<1x4xi32> to vector<1x4x1xi32>
    %211 = vector.broadcast %210 : vector<1x4x1xi32> to vector<1x4x256xi32>
    %212 = arith.cmpi sle, %10, %211 : vector<1x4x256xi32>
    %213 = arith.extui %212 : vector<1x4x256xi1> to vector<1x4x256xi32>
    %cst_54 = arith.constant dense<0> : vector<1x4xi32>
    %214 = vector.multi_reduction <add>, %213, %cst_54 [2] : vector<1x4x256xi32> to vector<1x4xi32>
    %c128_i32_55 = arith.constant 128 : i32
    %215 = vector.broadcast %c128_i32_55 : i32 to vector<1x4xi32>
    %216 = arith.cmpi sge, %214, %215 : vector<1x4xi32>
    %c1_i32_56 = arith.constant 1 : i32
    %217 = vector.broadcast %c1_i32_56 : i32 to vector<1x4xi32>
    %218 = arith.addi %209, %217 : vector<1x4xi32>
    %219 = arith.select %216, %203, %218 : vector<1x4xi1>, vector<1x4xi32>
    %220 = arith.select %216, %209, %204 : vector<1x4xi1>, vector<1x4xi32>
    %c13_i32 = arith.constant 13 : i32
    %221 = arith.andi %219, %220 : vector<1x4xi32>
    %222 = arith.xori %219, %220 : vector<1x4xi32>
    %c1_i32_57 = arith.constant 1 : i32
    %223 = vector.broadcast %c1_i32_57 : i32 to vector<1x4xi32>
    %224 = arith.shrsi %222, %223 : vector<1x4xi32>
    %225 = arith.addi %221, %224 : vector<1x4xi32>
    %226 = vector.shape_cast %225 : vector<1x4xi32> to vector<1x4x1xi32>
    %227 = vector.broadcast %226 : vector<1x4x1xi32> to vector<1x4x256xi32>
    %228 = arith.cmpi sle, %10, %227 : vector<1x4x256xi32>
    %229 = arith.extui %228 : vector<1x4x256xi1> to vector<1x4x256xi32>
    %cst_58 = arith.constant dense<0> : vector<1x4xi32>
    %230 = vector.multi_reduction <add>, %229, %cst_58 [2] : vector<1x4x256xi32> to vector<1x4xi32>
    %c128_i32_59 = arith.constant 128 : i32
    %231 = vector.broadcast %c128_i32_59 : i32 to vector<1x4xi32>
    %232 = arith.cmpi sge, %230, %231 : vector<1x4xi32>
    %c1_i32_60 = arith.constant 1 : i32
    %233 = vector.broadcast %c1_i32_60 : i32 to vector<1x4xi32>
    %234 = arith.addi %225, %233 : vector<1x4xi32>
    %235 = arith.select %232, %219, %234 : vector<1x4xi1>, vector<1x4xi32>
    %236 = arith.select %232, %225, %220 : vector<1x4xi1>, vector<1x4xi32>
    %c14_i32 = arith.constant 14 : i32
    %237 = arith.andi %235, %236 : vector<1x4xi32>
    %238 = arith.xori %235, %236 : vector<1x4xi32>
    %c1_i32_61 = arith.constant 1 : i32
    %239 = vector.broadcast %c1_i32_61 : i32 to vector<1x4xi32>
    %240 = arith.shrsi %238, %239 : vector<1x4xi32>
    %241 = arith.addi %237, %240 : vector<1x4xi32>
    %242 = vector.shape_cast %241 : vector<1x4xi32> to vector<1x4x1xi32>
    %243 = vector.broadcast %242 : vector<1x4x1xi32> to vector<1x4x256xi32>
    %244 = arith.cmpi sle, %10, %243 : vector<1x4x256xi32>
    %245 = arith.extui %244 : vector<1x4x256xi1> to vector<1x4x256xi32>
    %cst_62 = arith.constant dense<0> : vector<1x4xi32>
    %246 = vector.multi_reduction <add>, %245, %cst_62 [2] : vector<1x4x256xi32> to vector<1x4xi32>
    %c128_i32_63 = arith.constant 128 : i32
    %247 = vector.broadcast %c128_i32_63 : i32 to vector<1x4xi32>
    %248 = arith.cmpi sge, %246, %247 : vector<1x4xi32>
    %c1_i32_64 = arith.constant 1 : i32
    %249 = vector.broadcast %c1_i32_64 : i32 to vector<1x4xi32>
    %250 = arith.addi %241, %249 : vector<1x4xi32>
    %251 = arith.select %248, %235, %250 : vector<1x4xi1>, vector<1x4xi32>
    %252 = arith.select %248, %241, %236 : vector<1x4xi1>, vector<1x4xi32>
    %c15_i32 = arith.constant 15 : i32
    %253 = arith.andi %251, %252 : vector<1x4xi32>
    %254 = arith.xori %251, %252 : vector<1x4xi32>
    %c1_i32_65 = arith.constant 1 : i32
    %255 = vector.broadcast %c1_i32_65 : i32 to vector<1x4xi32>
    %256 = arith.shrsi %254, %255 : vector<1x4xi32>
    %257 = arith.addi %253, %256 : vector<1x4xi32>
    %258 = vector.shape_cast %257 : vector<1x4xi32> to vector<1x4x1xi32>
    %259 = vector.broadcast %258 : vector<1x4x1xi32> to vector<1x4x256xi32>
    %260 = arith.cmpi sle, %10, %259 : vector<1x4x256xi32>
    %261 = arith.extui %260 : vector<1x4x256xi1> to vector<1x4x256xi32>
    %cst_66 = arith.constant dense<0> : vector<1x4xi32>
    %262 = vector.multi_reduction <add>, %261, %cst_66 [2] : vector<1x4x256xi32> to vector<1x4xi32>
    %c128_i32_67 = arith.constant 128 : i32
    %263 = vector.broadcast %c128_i32_67 : i32 to vector<1x4xi32>
    %264 = arith.cmpi sge, %262, %263 : vector<1x4xi32>
    %c1_i32_68 = arith.constant 1 : i32
    %265 = vector.broadcast %c1_i32_68 : i32 to vector<1x4xi32>
    %266 = arith.addi %257, %265 : vector<1x4xi32>
    %267 = arith.select %264, %251, %266 : vector<1x4xi1>, vector<1x4xi32>
    %268 = arith.select %264, %257, %252 : vector<1x4xi1>, vector<1x4xi32>
    %c16_i32 = arith.constant 16 : i32
    %269 = arith.andi %267, %268 : vector<1x4xi32>
    %270 = arith.xori %267, %268 : vector<1x4xi32>
    %c1_i32_69 = arith.constant 1 : i32
    %271 = vector.broadcast %c1_i32_69 : i32 to vector<1x4xi32>
    %272 = arith.shrsi %270, %271 : vector<1x4xi32>
    %273 = arith.addi %269, %272 : vector<1x4xi32>
    %274 = vector.shape_cast %273 : vector<1x4xi32> to vector<1x4x1xi32>
    %275 = vector.broadcast %274 : vector<1x4x1xi32> to vector<1x4x256xi32>
    %276 = arith.cmpi sle, %10, %275 : vector<1x4x256xi32>
    %277 = arith.extui %276 : vector<1x4x256xi1> to vector<1x4x256xi32>
    %cst_70 = arith.constant dense<0> : vector<1x4xi32>
    %278 = vector.multi_reduction <add>, %277, %cst_70 [2] : vector<1x4x256xi32> to vector<1x4xi32>
    %c128_i32_71 = arith.constant 128 : i32
    %279 = vector.broadcast %c128_i32_71 : i32 to vector<1x4xi32>
    %280 = arith.cmpi sge, %278, %279 : vector<1x4xi32>
    %c1_i32_72 = arith.constant 1 : i32
    %281 = vector.broadcast %c1_i32_72 : i32 to vector<1x4xi32>
    %282 = arith.addi %273, %281 : vector<1x4xi32>
    %283 = arith.select %280, %267, %282 : vector<1x4xi1>, vector<1x4xi32>
    %284 = arith.select %280, %273, %268 : vector<1x4xi1>, vector<1x4xi32>
    %c17_i32 = arith.constant 17 : i32
    %285 = arith.andi %283, %284 : vector<1x4xi32>
    %286 = arith.xori %283, %284 : vector<1x4xi32>
    %c1_i32_73 = arith.constant 1 : i32
    %287 = vector.broadcast %c1_i32_73 : i32 to vector<1x4xi32>
    %288 = arith.shrsi %286, %287 : vector<1x4xi32>
    %289 = arith.addi %285, %288 : vector<1x4xi32>
    %290 = vector.shape_cast %289 : vector<1x4xi32> to vector<1x4x1xi32>
    %291 = vector.broadcast %290 : vector<1x4x1xi32> to vector<1x4x256xi32>
    %292 = arith.cmpi sle, %10, %291 : vector<1x4x256xi32>
    %293 = arith.extui %292 : vector<1x4x256xi1> to vector<1x4x256xi32>
    %cst_74 = arith.constant dense<0> : vector<1x4xi32>
    %294 = vector.multi_reduction <add>, %293, %cst_74 [2] : vector<1x4x256xi32> to vector<1x4xi32>
    %c128_i32_75 = arith.constant 128 : i32
    %295 = vector.broadcast %c128_i32_75 : i32 to vector<1x4xi32>
    %296 = arith.cmpi sge, %294, %295 : vector<1x4xi32>
    %c1_i32_76 = arith.constant 1 : i32
    %297 = vector.broadcast %c1_i32_76 : i32 to vector<1x4xi32>
    %298 = arith.addi %289, %297 : vector<1x4xi32>
    %299 = arith.select %296, %283, %298 : vector<1x4xi1>, vector<1x4xi32>
    %300 = arith.select %296, %289, %284 : vector<1x4xi1>, vector<1x4xi32>
    %c18_i32 = arith.constant 18 : i32
    %301 = arith.andi %299, %300 : vector<1x4xi32>
    %302 = arith.xori %299, %300 : vector<1x4xi32>
    %c1_i32_77 = arith.constant 1 : i32
    %303 = vector.broadcast %c1_i32_77 : i32 to vector<1x4xi32>
    %304 = arith.shrsi %302, %303 : vector<1x4xi32>
    %305 = arith.addi %301, %304 : vector<1x4xi32>
    %306 = vector.shape_cast %305 : vector<1x4xi32> to vector<1x4x1xi32>
    %307 = vector.broadcast %306 : vector<1x4x1xi32> to vector<1x4x256xi32>
    %308 = arith.cmpi sle, %10, %307 : vector<1x4x256xi32>
    %309 = arith.extui %308 : vector<1x4x256xi1> to vector<1x4x256xi32>
    %cst_78 = arith.constant dense<0> : vector<1x4xi32>
    %310 = vector.multi_reduction <add>, %309, %cst_78 [2] : vector<1x4x256xi32> to vector<1x4xi32>
    %c128_i32_79 = arith.constant 128 : i32
    %311 = vector.broadcast %c128_i32_79 : i32 to vector<1x4xi32>
    %312 = arith.cmpi sge, %310, %311 : vector<1x4xi32>
    %c1_i32_80 = arith.constant 1 : i32
    %313 = vector.broadcast %c1_i32_80 : i32 to vector<1x4xi32>
    %314 = arith.addi %305, %313 : vector<1x4xi32>
    %315 = arith.select %312, %299, %314 : vector<1x4xi1>, vector<1x4xi32>
    %316 = arith.select %312, %305, %300 : vector<1x4xi1>, vector<1x4xi32>
    %c19_i32 = arith.constant 19 : i32
    %317 = arith.andi %315, %316 : vector<1x4xi32>
    %318 = arith.xori %315, %316 : vector<1x4xi32>
    %c1_i32_81 = arith.constant 1 : i32
    %319 = vector.broadcast %c1_i32_81 : i32 to vector<1x4xi32>
    %320 = arith.shrsi %318, %319 : vector<1x4xi32>
    %321 = arith.addi %317, %320 : vector<1x4xi32>
    %322 = vector.shape_cast %321 : vector<1x4xi32> to vector<1x4x1xi32>
    %323 = vector.broadcast %322 : vector<1x4x1xi32> to vector<1x4x256xi32>
    %324 = arith.cmpi sle, %10, %323 : vector<1x4x256xi32>
    %325 = arith.extui %324 : vector<1x4x256xi1> to vector<1x4x256xi32>
    %cst_82 = arith.constant dense<0> : vector<1x4xi32>
    %326 = vector.multi_reduction <add>, %325, %cst_82 [2] : vector<1x4x256xi32> to vector<1x4xi32>
    %c128_i32_83 = arith.constant 128 : i32
    %327 = vector.broadcast %c128_i32_83 : i32 to vector<1x4xi32>
    %328 = arith.cmpi sge, %326, %327 : vector<1x4xi32>
    %c1_i32_84 = arith.constant 1 : i32
    %329 = vector.broadcast %c1_i32_84 : i32 to vector<1x4xi32>
    %330 = arith.addi %321, %329 : vector<1x4xi32>
    %331 = arith.select %328, %315, %330 : vector<1x4xi1>, vector<1x4xi32>
    %332 = arith.select %328, %321, %316 : vector<1x4xi1>, vector<1x4xi32>
    %c20_i32 = arith.constant 20 : i32
    %333 = arith.andi %331, %332 : vector<1x4xi32>
    %334 = arith.xori %331, %332 : vector<1x4xi32>
    %c1_i32_85 = arith.constant 1 : i32
    %335 = vector.broadcast %c1_i32_85 : i32 to vector<1x4xi32>
    %336 = arith.shrsi %334, %335 : vector<1x4xi32>
    %337 = arith.addi %333, %336 : vector<1x4xi32>
    %338 = vector.shape_cast %337 : vector<1x4xi32> to vector<1x4x1xi32>
    %339 = vector.broadcast %338 : vector<1x4x1xi32> to vector<1x4x256xi32>
    %340 = arith.cmpi sle, %10, %339 : vector<1x4x256xi32>
    %341 = arith.extui %340 : vector<1x4x256xi1> to vector<1x4x256xi32>
    %cst_86 = arith.constant dense<0> : vector<1x4xi32>
    %342 = vector.multi_reduction <add>, %341, %cst_86 [2] : vector<1x4x256xi32> to vector<1x4xi32>
    %c128_i32_87 = arith.constant 128 : i32
    %343 = vector.broadcast %c128_i32_87 : i32 to vector<1x4xi32>
    %344 = arith.cmpi sge, %342, %343 : vector<1x4xi32>
    %c1_i32_88 = arith.constant 1 : i32
    %345 = vector.broadcast %c1_i32_88 : i32 to vector<1x4xi32>
    %346 = arith.addi %337, %345 : vector<1x4xi32>
    %347 = arith.select %344, %331, %346 : vector<1x4xi1>, vector<1x4xi32>
    %348 = arith.select %344, %337, %332 : vector<1x4xi1>, vector<1x4xi32>
    %c21_i32 = arith.constant 21 : i32
    %349 = arith.andi %347, %348 : vector<1x4xi32>
    %350 = arith.xori %347, %348 : vector<1x4xi32>
    %c1_i32_89 = arith.constant 1 : i32
    %351 = vector.broadcast %c1_i32_89 : i32 to vector<1x4xi32>
    %352 = arith.shrsi %350, %351 : vector<1x4xi32>
    %353 = arith.addi %349, %352 : vector<1x4xi32>
    %354 = vector.shape_cast %353 : vector<1x4xi32> to vector<1x4x1xi32>
    %355 = vector.broadcast %354 : vector<1x4x1xi32> to vector<1x4x256xi32>
    %356 = arith.cmpi sle, %10, %355 : vector<1x4x256xi32>
    %357 = arith.extui %356 : vector<1x4x256xi1> to vector<1x4x256xi32>
    %cst_90 = arith.constant dense<0> : vector<1x4xi32>
    %358 = vector.multi_reduction <add>, %357, %cst_90 [2] : vector<1x4x256xi32> to vector<1x4xi32>
    %c128_i32_91 = arith.constant 128 : i32
    %359 = vector.broadcast %c128_i32_91 : i32 to vector<1x4xi32>
    %360 = arith.cmpi sge, %358, %359 : vector<1x4xi32>
    %c1_i32_92 = arith.constant 1 : i32
    %361 = vector.broadcast %c1_i32_92 : i32 to vector<1x4xi32>
    %362 = arith.addi %353, %361 : vector<1x4xi32>
    %363 = arith.select %360, %347, %362 : vector<1x4xi1>, vector<1x4xi32>
    %364 = arith.select %360, %353, %348 : vector<1x4xi1>, vector<1x4xi32>
    %c22_i32 = arith.constant 22 : i32
    %365 = arith.andi %363, %364 : vector<1x4xi32>
    %366 = arith.xori %363, %364 : vector<1x4xi32>
    %c1_i32_93 = arith.constant 1 : i32
    %367 = vector.broadcast %c1_i32_93 : i32 to vector<1x4xi32>
    %368 = arith.shrsi %366, %367 : vector<1x4xi32>
    %369 = arith.addi %365, %368 : vector<1x4xi32>
    %370 = vector.shape_cast %369 : vector<1x4xi32> to vector<1x4x1xi32>
    %371 = vector.broadcast %370 : vector<1x4x1xi32> to vector<1x4x256xi32>
    %372 = arith.cmpi sle, %10, %371 : vector<1x4x256xi32>
    %373 = arith.extui %372 : vector<1x4x256xi1> to vector<1x4x256xi32>
    %cst_94 = arith.constant dense<0> : vector<1x4xi32>
    %374 = vector.multi_reduction <add>, %373, %cst_94 [2] : vector<1x4x256xi32> to vector<1x4xi32>
    %c128_i32_95 = arith.constant 128 : i32
    %375 = vector.broadcast %c128_i32_95 : i32 to vector<1x4xi32>
    %376 = arith.cmpi sge, %374, %375 : vector<1x4xi32>
    %c1_i32_96 = arith.constant 1 : i32
    %377 = vector.broadcast %c1_i32_96 : i32 to vector<1x4xi32>
    %378 = arith.addi %369, %377 : vector<1x4xi32>
    %379 = arith.select %376, %363, %378 : vector<1x4xi1>, vector<1x4xi32>
    %380 = arith.select %376, %369, %364 : vector<1x4xi1>, vector<1x4xi32>
    %c23_i32 = arith.constant 23 : i32
    %381 = arith.andi %379, %380 : vector<1x4xi32>
    %382 = arith.xori %379, %380 : vector<1x4xi32>
    %c1_i32_97 = arith.constant 1 : i32
    %383 = vector.broadcast %c1_i32_97 : i32 to vector<1x4xi32>
    %384 = arith.shrsi %382, %383 : vector<1x4xi32>
    %385 = arith.addi %381, %384 : vector<1x4xi32>
    %386 = vector.shape_cast %385 : vector<1x4xi32> to vector<1x4x1xi32>
    %387 = vector.broadcast %386 : vector<1x4x1xi32> to vector<1x4x256xi32>
    %388 = arith.cmpi sle, %10, %387 : vector<1x4x256xi32>
    %389 = arith.extui %388 : vector<1x4x256xi1> to vector<1x4x256xi32>
    %cst_98 = arith.constant dense<0> : vector<1x4xi32>
    %390 = vector.multi_reduction <add>, %389, %cst_98 [2] : vector<1x4x256xi32> to vector<1x4xi32>
    %c128_i32_99 = arith.constant 128 : i32
    %391 = vector.broadcast %c128_i32_99 : i32 to vector<1x4xi32>
    %392 = arith.cmpi sge, %390, %391 : vector<1x4xi32>
    %c1_i32_100 = arith.constant 1 : i32
    %393 = vector.broadcast %c1_i32_100 : i32 to vector<1x4xi32>
    %394 = arith.addi %385, %393 : vector<1x4xi32>
    %395 = arith.select %392, %379, %394 : vector<1x4xi1>, vector<1x4xi32>
    %396 = arith.select %392, %385, %380 : vector<1x4xi1>, vector<1x4xi32>
    %c24_i32 = arith.constant 24 : i32
    %397 = arith.andi %395, %396 : vector<1x4xi32>
    %398 = arith.xori %395, %396 : vector<1x4xi32>
    %c1_i32_101 = arith.constant 1 : i32
    %399 = vector.broadcast %c1_i32_101 : i32 to vector<1x4xi32>
    %400 = arith.shrsi %398, %399 : vector<1x4xi32>
    %401 = arith.addi %397, %400 : vector<1x4xi32>
    %402 = vector.shape_cast %401 : vector<1x4xi32> to vector<1x4x1xi32>
    %403 = vector.broadcast %402 : vector<1x4x1xi32> to vector<1x4x256xi32>
    %404 = arith.cmpi sle, %10, %403 : vector<1x4x256xi32>
    %405 = arith.extui %404 : vector<1x4x256xi1> to vector<1x4x256xi32>
    %cst_102 = arith.constant dense<0> : vector<1x4xi32>
    %406 = vector.multi_reduction <add>, %405, %cst_102 [2] : vector<1x4x256xi32> to vector<1x4xi32>
    %c128_i32_103 = arith.constant 128 : i32
    %407 = vector.broadcast %c128_i32_103 : i32 to vector<1x4xi32>
    %408 = arith.cmpi sge, %406, %407 : vector<1x4xi32>
    %c1_i32_104 = arith.constant 1 : i32
    %409 = vector.broadcast %c1_i32_104 : i32 to vector<1x4xi32>
    %410 = arith.addi %401, %409 : vector<1x4xi32>
    %411 = arith.select %408, %395, %410 : vector<1x4xi1>, vector<1x4xi32>
    %412 = arith.select %408, %401, %396 : vector<1x4xi1>, vector<1x4xi32>
    %c25_i32 = arith.constant 25 : i32
    %413 = arith.andi %411, %412 : vector<1x4xi32>
    %414 = arith.xori %411, %412 : vector<1x4xi32>
    %c1_i32_105 = arith.constant 1 : i32
    %415 = vector.broadcast %c1_i32_105 : i32 to vector<1x4xi32>
    %416 = arith.shrsi %414, %415 : vector<1x4xi32>
    %417 = arith.addi %413, %416 : vector<1x4xi32>
    %418 = vector.shape_cast %417 : vector<1x4xi32> to vector<1x4x1xi32>
    %419 = vector.broadcast %418 : vector<1x4x1xi32> to vector<1x4x256xi32>
    %420 = arith.cmpi sle, %10, %419 : vector<1x4x256xi32>
    %421 = arith.extui %420 : vector<1x4x256xi1> to vector<1x4x256xi32>
    %cst_106 = arith.constant dense<0> : vector<1x4xi32>
    %422 = vector.multi_reduction <add>, %421, %cst_106 [2] : vector<1x4x256xi32> to vector<1x4xi32>
    %c128_i32_107 = arith.constant 128 : i32
    %423 = vector.broadcast %c128_i32_107 : i32 to vector<1x4xi32>
    %424 = arith.cmpi sge, %422, %423 : vector<1x4xi32>
    %c1_i32_108 = arith.constant 1 : i32
    %425 = vector.broadcast %c1_i32_108 : i32 to vector<1x4xi32>
    %426 = arith.addi %417, %425 : vector<1x4xi32>
    %427 = arith.select %424, %411, %426 : vector<1x4xi1>, vector<1x4xi32>
    %428 = arith.select %424, %417, %412 : vector<1x4xi1>, vector<1x4xi32>
    %c26_i32 = arith.constant 26 : i32
    %429 = arith.andi %427, %428 : vector<1x4xi32>
    %430 = arith.xori %427, %428 : vector<1x4xi32>
    %c1_i32_109 = arith.constant 1 : i32
    %431 = vector.broadcast %c1_i32_109 : i32 to vector<1x4xi32>
    %432 = arith.shrsi %430, %431 : vector<1x4xi32>
    %433 = arith.addi %429, %432 : vector<1x4xi32>
    %434 = vector.shape_cast %433 : vector<1x4xi32> to vector<1x4x1xi32>
    %435 = vector.broadcast %434 : vector<1x4x1xi32> to vector<1x4x256xi32>
    %436 = arith.cmpi sle, %10, %435 : vector<1x4x256xi32>
    %437 = arith.extui %436 : vector<1x4x256xi1> to vector<1x4x256xi32>
    %cst_110 = arith.constant dense<0> : vector<1x4xi32>
    %438 = vector.multi_reduction <add>, %437, %cst_110 [2] : vector<1x4x256xi32> to vector<1x4xi32>
    %c128_i32_111 = arith.constant 128 : i32
    %439 = vector.broadcast %c128_i32_111 : i32 to vector<1x4xi32>
    %440 = arith.cmpi sge, %438, %439 : vector<1x4xi32>
    %c1_i32_112 = arith.constant 1 : i32
    %441 = vector.broadcast %c1_i32_112 : i32 to vector<1x4xi32>
    %442 = arith.addi %433, %441 : vector<1x4xi32>
    %443 = arith.select %440, %427, %442 : vector<1x4xi1>, vector<1x4xi32>
    %444 = arith.select %440, %433, %428 : vector<1x4xi1>, vector<1x4xi32>
    %c27_i32 = arith.constant 27 : i32
    %445 = arith.andi %443, %444 : vector<1x4xi32>
    %446 = arith.xori %443, %444 : vector<1x4xi32>
    %c1_i32_113 = arith.constant 1 : i32
    %447 = vector.broadcast %c1_i32_113 : i32 to vector<1x4xi32>
    %448 = arith.shrsi %446, %447 : vector<1x4xi32>
    %449 = arith.addi %445, %448 : vector<1x4xi32>
    %450 = vector.shape_cast %449 : vector<1x4xi32> to vector<1x4x1xi32>
    %451 = vector.broadcast %450 : vector<1x4x1xi32> to vector<1x4x256xi32>
    %452 = arith.cmpi sle, %10, %451 : vector<1x4x256xi32>
    %453 = arith.extui %452 : vector<1x4x256xi1> to vector<1x4x256xi32>
    %cst_114 = arith.constant dense<0> : vector<1x4xi32>
    %454 = vector.multi_reduction <add>, %453, %cst_114 [2] : vector<1x4x256xi32> to vector<1x4xi32>
    %c128_i32_115 = arith.constant 128 : i32
    %455 = vector.broadcast %c128_i32_115 : i32 to vector<1x4xi32>
    %456 = arith.cmpi sge, %454, %455 : vector<1x4xi32>
    %c1_i32_116 = arith.constant 1 : i32
    %457 = vector.broadcast %c1_i32_116 : i32 to vector<1x4xi32>
    %458 = arith.addi %449, %457 : vector<1x4xi32>
    %459 = arith.select %456, %443, %458 : vector<1x4xi1>, vector<1x4xi32>
    %460 = arith.select %456, %449, %444 : vector<1x4xi1>, vector<1x4xi32>
    %c28_i32 = arith.constant 28 : i32
    %461 = arith.andi %459, %460 : vector<1x4xi32>
    %462 = arith.xori %459, %460 : vector<1x4xi32>
    %c1_i32_117 = arith.constant 1 : i32
    %463 = vector.broadcast %c1_i32_117 : i32 to vector<1x4xi32>
    %464 = arith.shrsi %462, %463 : vector<1x4xi32>
    %465 = arith.addi %461, %464 : vector<1x4xi32>
    %466 = vector.shape_cast %465 : vector<1x4xi32> to vector<1x4x1xi32>
    %467 = vector.broadcast %466 : vector<1x4x1xi32> to vector<1x4x256xi32>
    %468 = arith.cmpi sle, %10, %467 : vector<1x4x256xi32>
    %469 = arith.extui %468 : vector<1x4x256xi1> to vector<1x4x256xi32>
    %cst_118 = arith.constant dense<0> : vector<1x4xi32>
    %470 = vector.multi_reduction <add>, %469, %cst_118 [2] : vector<1x4x256xi32> to vector<1x4xi32>
    %c128_i32_119 = arith.constant 128 : i32
    %471 = vector.broadcast %c128_i32_119 : i32 to vector<1x4xi32>
    %472 = arith.cmpi sge, %470, %471 : vector<1x4xi32>
    %c1_i32_120 = arith.constant 1 : i32
    %473 = vector.broadcast %c1_i32_120 : i32 to vector<1x4xi32>
    %474 = arith.addi %465, %473 : vector<1x4xi32>
    %475 = arith.select %472, %459, %474 : vector<1x4xi1>, vector<1x4xi32>
    %476 = arith.select %472, %465, %460 : vector<1x4xi1>, vector<1x4xi32>
    %c29_i32 = arith.constant 29 : i32
    %477 = arith.andi %475, %476 : vector<1x4xi32>
    %478 = arith.xori %475, %476 : vector<1x4xi32>
    %c1_i32_121 = arith.constant 1 : i32
    %479 = vector.broadcast %c1_i32_121 : i32 to vector<1x4xi32>
    %480 = arith.shrsi %478, %479 : vector<1x4xi32>
    %481 = arith.addi %477, %480 : vector<1x4xi32>
    %482 = vector.shape_cast %481 : vector<1x4xi32> to vector<1x4x1xi32>
    %483 = vector.broadcast %482 : vector<1x4x1xi32> to vector<1x4x256xi32>
    %484 = arith.cmpi sle, %10, %483 : vector<1x4x256xi32>
    %485 = arith.extui %484 : vector<1x4x256xi1> to vector<1x4x256xi32>
    %cst_122 = arith.constant dense<0> : vector<1x4xi32>
    %486 = vector.multi_reduction <add>, %485, %cst_122 [2] : vector<1x4x256xi32> to vector<1x4xi32>
    %c128_i32_123 = arith.constant 128 : i32
    %487 = vector.broadcast %c128_i32_123 : i32 to vector<1x4xi32>
    %488 = arith.cmpi sge, %486, %487 : vector<1x4xi32>
    %c1_i32_124 = arith.constant 1 : i32
    %489 = vector.broadcast %c1_i32_124 : i32 to vector<1x4xi32>
    %490 = arith.addi %481, %489 : vector<1x4xi32>
    %491 = arith.select %488, %475, %490 : vector<1x4xi1>, vector<1x4xi32>
    %492 = arith.select %488, %481, %476 : vector<1x4xi1>, vector<1x4xi32>
    %c30_i32 = arith.constant 30 : i32
    %493 = arith.andi %491, %492 : vector<1x4xi32>
    %494 = arith.xori %491, %492 : vector<1x4xi32>
    %c1_i32_125 = arith.constant 1 : i32
    %495 = vector.broadcast %c1_i32_125 : i32 to vector<1x4xi32>
    %496 = arith.shrsi %494, %495 : vector<1x4xi32>
    %497 = arith.addi %493, %496 : vector<1x4xi32>
    %498 = vector.shape_cast %497 : vector<1x4xi32> to vector<1x4x1xi32>
    %499 = vector.broadcast %498 : vector<1x4x1xi32> to vector<1x4x256xi32>
    %500 = arith.cmpi sle, %10, %499 : vector<1x4x256xi32>
    %501 = arith.extui %500 : vector<1x4x256xi1> to vector<1x4x256xi32>
    %cst_126 = arith.constant dense<0> : vector<1x4xi32>
    %502 = vector.multi_reduction <add>, %501, %cst_126 [2] : vector<1x4x256xi32> to vector<1x4xi32>
    %c128_i32_127 = arith.constant 128 : i32
    %503 = vector.broadcast %c128_i32_127 : i32 to vector<1x4xi32>
    %504 = arith.cmpi sge, %502, %503 : vector<1x4xi32>
    %c1_i32_128 = arith.constant 1 : i32
    %505 = vector.broadcast %c1_i32_128 : i32 to vector<1x4xi32>
    %506 = arith.addi %497, %505 : vector<1x4xi32>
    %507 = arith.select %504, %491, %506 : vector<1x4xi1>, vector<1x4xi32>
    %508 = arith.select %504, %497, %492 : vector<1x4xi1>, vector<1x4xi32>
    %c31_i32 = arith.constant 31 : i32
    %509 = arith.andi %507, %508 : vector<1x4xi32>
    %510 = arith.xori %507, %508 : vector<1x4xi32>
    %c1_i32_129 = arith.constant 1 : i32
    %511 = vector.broadcast %c1_i32_129 : i32 to vector<1x4xi32>
    %512 = arith.shrsi %510, %511 : vector<1x4xi32>
    %513 = arith.addi %509, %512 : vector<1x4xi32>
    %514 = vector.shape_cast %513 : vector<1x4xi32> to vector<1x4x1xi32>
    %515 = vector.broadcast %514 : vector<1x4x1xi32> to vector<1x4x256xi32>
    %516 = arith.cmpi sle, %10, %515 : vector<1x4x256xi32>
    %517 = arith.extui %516 : vector<1x4x256xi1> to vector<1x4x256xi32>
    %cst_130 = arith.constant dense<0> : vector<1x4xi32>
    %518 = vector.multi_reduction <add>, %517, %cst_130 [2] : vector<1x4x256xi32> to vector<1x4xi32>
    %c128_i32_131 = arith.constant 128 : i32
    %519 = vector.broadcast %c128_i32_131 : i32 to vector<1x4xi32>
    %520 = arith.cmpi sge, %518, %519 : vector<1x4xi32>
    %c1_i32_132 = arith.constant 1 : i32
    %521 = vector.broadcast %c1_i32_132 : i32 to vector<1x4xi32>
    %522 = arith.addi %513, %521 : vector<1x4xi32>
    %523 = arith.select %520, %507, %522 : vector<1x4xi1>, vector<1x4xi32>
    %524 = arith.select %520, %513, %508 : vector<1x4xi1>, vector<1x4xi32>
    %c0_i32_133 = arith.constant 0 : i32
    %525 = vector.broadcast %c0_i32_133 : i32 to vector<1x4xi32>
    %526 = arith.cmpi sge, %523, %525 : vector<1x4xi32>
    %c2147483647_i32_134 = arith.constant 2147483647 : i32
    %527 = vector.broadcast %c2147483647_i32_134 : i32 to vector<1x4xi32>
    %528 = arith.xori %523, %527 : vector<1x4xi32>
    %529 = arith.select %526, %523, %528 : vector<1x4xi1>, vector<1x4xi32>
    %530 = tpu.bitcast %529 : vector<1x4xi32> -> vector<1x4xf32>
    %531 = tpu.concatenate %3, %4, %530 in 0 : vector<1x4xf32>, vector<1x4xf32>, vector<1x4xf32> -> vector<3x4xf32>
    %c0_135 = arith.constant 0 : index
    %c0_136 = arith.constant 0 : index
    %532 = vector.load %arg2[%c0_135, %c0_136] : memref<4x8xf32, #tpu.memory_space<vmem>>, vector<4x8xf32>
    %cst_137 = arith.constant dense<0.000000e+00> : vector<3x8xf32>
    %533 = tpu.matmul %531, %532, %cst_137 {dimension_numbers = #tpu.dot_dimension_numbers<[1], [0], [0], [1], [0, 0, 1, 1], [], []>} : vector<3x4xf32>, vector<4x8xf32>, vector<3x8xf32> -> vector<3x8xf32>
    %c0_138 = arith.constant 0 : index
    %c0_139 = arith.constant 0 : index
    %534 = vector.load %arg3[%c0_138, %c0_139] : memref<1x8xf32, #tpu.memory_space<vmem>>, vector<1x8xf32>
    %535 = vector.broadcast %534 : vector<1x8xf32> to vector<3x8xf32>
    %536 = arith.addf %533, %535 : vector<3x8xf32>
    %cst_140 = arith.constant 0.000000e+00 : f32
    %537 = vector.broadcast %cst_140 : f32 to vector<3x8xf32>
    %538 = arith.maximumf %536, %537 : vector<3x8xf32>
    %539 = vector.extract_strided_slice %538 {offsets = [0, 0], sizes = [1, 8], strides = [1, 1]} : vector<3x8xf32> to vector<1x8xf32>
    %540 = vector.extract_strided_slice %538 {offsets = [1, 0], sizes = [1, 8], strides = [1, 1]} : vector<3x8xf32> to vector<1x8xf32>
    %541 = arith.addf %539, %540 : vector<1x8xf32>
    %542 = vector.extract_strided_slice %538 {offsets = [2, 0], sizes = [1, 8], strides = [1, 1]} : vector<3x8xf32> to vector<1x8xf32>
    %543 = arith.addf %541, %542 : vector<1x8xf32>
    %c0_141 = arith.constant 0 : index
    %c0_142 = arith.constant 0 : index
    %544 = vector.load %arg4[%c0_141, %c0_142] : memref<8x4xf32, #tpu.memory_space<vmem>>, vector<8x4xf32>
    %cst_143 = arith.constant dense<0.000000e+00> : vector<1x4xf32>
    %545 = tpu.matmul %543, %544, %cst_143 {dimension_numbers = #tpu.dot_dimension_numbers<[1], [0], [0], [1], [0, 0, 1, 1], [], []>} : vector<1x8xf32>, vector<8x4xf32>, vector<1x4xf32> -> vector<1x4xf32>
    %c0_144 = arith.constant 0 : index
    %c0_145 = arith.constant 0 : index
    %546 = vector.load %arg5[%c0_144, %c0_145] : memref<1x4xf32, #tpu.memory_space<vmem>>, vector<1x4xf32>
    %cst_146 = arith.constant 3.000000e+00 : f32
    %547 = vector.broadcast %cst_146 : f32 to vector<1x4xf32>
    %548 = arith.mulf %547, %546 : vector<1x4xf32>
    %549 = arith.addf %545, %548 : vector<1x4xf32>
    %550 = arith.negf %549 : vector<1x4xf32>
    %551 = math.exp %550 : vector<1x4xf32>
    %cst_147 = arith.constant 1.000000e+00 : f32
    %552 = vector.broadcast %cst_147 : f32 to vector<1x4xf32>
    %553 = arith.addf %552, %551 : vector<1x4xf32>
    %554 = arith.divf %552, %553 : vector<1x4xf32>
    %555 = vector.shape_cast %554 : vector<1x4xf32> to vector<1x1x4xf32>
    %c0_148 = arith.constant 0 : index
    %c0_149 = arith.constant 0 : index
    %c0_150 = arith.constant 0 : index
    %556 = vector.load %arg6[%c0_148, %c0_149, %c0_150] : memref<1x1x4xf32, #tpu.memory_space<vmem>>, vector<1x1x4xf32>
    tpu.vector_store %arg6[%c0_148, %c0_149, %c0_150], %555 {strides = array<i32>} : memref<1x1x4xf32, #tpu.memory_space<vmem>>, vector<1x1x4xf32>,
    return
  }
  func.func @transform_0(%arg0: i32) -> (i32, i32, i32) {
    %c0_i32 = arith.constant 0 : i32
    %c0_i32_0 = arith.constant 0 : i32
    %c0_i32_1 = arith.constant 0 : i32
    return %arg0, %c0_i32, %c0_i32_0 : i32, i32, i32
  }
  func.func @transform_1(%arg0: i32) -> (i32, i32) {
    %c0_i32 = arith.constant 0 : i32
    %c0_i32_0 = arith.constant 0 : i32
    %c0_i32_1 = arith.constant 0 : i32
    return %c0_i32, %c0_i32_0 : i32, i32
  }
  func.func @transform_2(%arg0: i32) -> (i32, i32) {
    %c0_i32 = arith.constant 0 : i32
    %c0_i32_0 = arith.constant 0 : i32
    %c0_i32_1 = arith.constant 0 : i32
    return %c0_i32, %c0_i32_0 : i32, i32
  }
  func.func @transform_3(%arg0: i32) -> (i32, i32) {
    %c0_i32 = arith.constant 0 : i32
    %c0_i32_0 = arith.constant 0 : i32
    %c0_i32_1 = arith.constant 0 : i32
    return %c0_i32, %c0_i32_0 : i32, i32
  }
  func.func @transform_4(%arg0: i32) -> (i32, i32) {
    %c0_i32 = arith.constant 0 : i32
    %c0_i32_0 = arith.constant 0 : i32
    %c0_i32_1 = arith.constant 0 : i32
    return %c0_i32, %c0_i32_0 : i32, i32
  }
  func.func @transform_5(%arg0: i32) -> (i32, i32, i32) {
    %c0_i32 = arith.constant 0 : i32
    %c0_i32_0 = arith.constant 0 : i32
    %c0_i32_1 = arith.constant 0 : i32
    return %arg0, %c0_i32, %c0_i32_0 : i32, i32, i32
  }
}

</mosaic_0001>

<bundles_post_ra>
// kernel: tpu_custom_call.1
= control target key start
LH: loop header
LB: loop body
LE: loop exit
PB: predicated region body
PF: predicated region fallthrough
CT: control target
= control target key end

     0   :  { %10 = vsyncpa [#allocation3], 0  ;;  %s2012_s0 = inlined_call_operand.hbm [shape: f32[2,4,256], index: 0, kind: input, shape index: {}]   ;;  %s2013_s1 = inlined_call_operand.vmem [shape: f32[4,8], index: 1, kind: input, shape index: {}]   ;;  %s2014_s2 = inlined_call_operand.vmem [shape: f32[1,8], index: 2, kind: input, shape index: {}]   ;;  %s2015_s3 = inlined_call_operand.vmem [shape: f32[8,4], index: 3, kind: input, shape index: {}]   ;;  %s2016_s4 = inlined_call_operand.vmem [shape: f32[1,4], index: 4, kind: input, shape index: {}]   ;;  %s2017_s5 = inlined_call_operand.hbm [shape: f32[2,1,4], index: 5, kind: output, shape index: {}]  }
   0x1   :  { %12 = vsyncpa [#allocation3 + $0x1], 0 }
   0x2   :  { %13 = vsyncpa [#allocation4], 0 }
   0x3   :  { %15 = vsyncpa [#allocation4 + $0x1], 0  ;;  %s1625_s18 = smov 0   ;;  %s1627_s19 = smov 0  }
   0x4   :  { %s1629_s20 = smov 0   ;;  %s1631_s21 = smov 0  }
   0x5 LB: > { %s1646_s22 = sadd.s32 4294967295, %s1587_s21   ;;  %s1404_s23 = sadd.s32 4294967294, %s1587_s21   ;;  %s1587_s21 = sphi %s1631_s21, %s2032_s21   ;;  %s1583_s20 = sphi %s1629_s20, %s2031_s20   ;;  %s1579_s19 = sphi %s1627_s19, %s2030_s19   ;;  %s1575_s18 = sphi %s1625_s18, %s2029_s18  }
   0x6   : > { %s1650_s24 = sadd.s32 1, %s1587_s21   ;;  %s28_s25 = sadd.s32 1, %s1583_s20 }
   0x7   : > { %s25_s26 = ssub.s32 %s1587_s21, %s1650_s24  ;;  %p35_p0 = scmp.ne.s32.totalorder %s1583_s20, %s1579_s19 }
   0x8   : > { %p26_p1 = scmp.eq.s32.totalorder %s25_s26, 0  ;;  %p36_p2 = scmp.eq.s32.totalorder %s1587_s21, 0 }
   0x9   : > { %p41_p3 = scmp.ne.s32.totalorder %s1579_s19, %s1575_s18  ;;  %p42_p4 = scmp.eq.s32.totalorder %s1646_s22, 0 }
   0xa   : > { %s1662_s27 = scalar_select %p26_p1, %s1583_s20, %s28_s25  }
   0xb   : > { %p1664_p5 = por %p36_p2, %p35_p0  ;;  %p1668_p6 = por %p42_p4, %p41_p3 }
   0xc   : > { %p149_p7 = scmp.eq.s32.totalorder %s1646_s22, 1  ;;  %p155_p8 = scmp.eq.s32.totalorder %s1404_s23, 1 }
   0xd   : > { %p1447_p10 = scmp.lt.s32.totalorder %s1587_s21, 2  ;;  %s187_s7 = sand.u32 1, %s1583_s20  }
   0xe   : > { %p1675_p11 = por %p149_p7, %p35_p0  ;;  %p1679_p12 = por %p155_p8, %p41_p3 }
   0xf   : > { %s1420_s8 = sshll.u32 %s1587_s21, 7  ;;  %s1407_s9 = sshll.u32 %s187_s7, 3 }
  0x10   : > { %s2021_s30 = scalar_select %p1675_p11, 1, 0 }
  0x11   : > { %s2022_s6 = scalar_select %p1679_p12, 1, 0 }
  0x12   : > { %s1688_s12 = scalar_lea.hbm %s2012_s0, %s1420_s8  ;;  %s191_s13 = scalar_lea.vmem [#allocation2], %s1407_s9 }
  0x13   : > { %s199_s14 = sshll.u32 %s191_s13, 4  ;;  %p1692_p13 = pnand %p1447_p10, %p1664_p5  ;;  %s1696_s14 = int_to_ptr.vmem [resolvable:$true] %s199_s14 }
  0x14   : > { %s188_s16 = scalar_lea.sflag [#allocation3], %s187_s7  ;;  %s1491_s17 = scalar_lea.hbm %s1688_s12, 128 }
  0x15   : > { %p1492_p2 = scmp.ne.s32.totalorder %s1688_s12, %s1491_s17  ;;  %p1493_p3 = pneg %p1692_p13 }
  0x16   : > { %s1496_s26 = scalar_lea.hbm %s2012_s0, 256  ;;  %p1497_p5 = scmp.lt.u32.totalorder %s1688_s12, %s2012_s0 }
  0x17   : > { %p1494_p4 = pnand %p1493_p3, %p1492_p2  ;;  %p1498_p8 = scmp.lt.u32.totalorder %s1496_s26, %s1491_s17 }
  0x18   : > { %p1500_p9 = scmp.lt.u32.totalorder %s1491_s17, %s1688_s12 }
  0x19   : > { %p1495_p7 = pneg %p1494_p4  ;;  %p1499_p10 = por %p1498_p8, %p1497_p5 }
  0x1b   : > { %p1501_p0 = por %p1500_p9, %p1499_p10 }
  0x1d   : > { %p1502_p1 = pnand %p1501_p0, %p1495_p7 }
  0x1f   : > { %1505 = shalt.err (!%p1502_p1)
}
  0x20   : > { %s1506_s7 = scalar_lea.vmem %s1696_s14, 128  ;;  %s1589_s9 = smov [#allocation2]  }
  0x21   : > { %p1507_p2 = scmp.ne.s32.totalorder %s1696_s14, %s1506_s7  ;;  %s1511_s10 = sshll.u32 %s1589_s9, 4  ;;  %s1512_s10 = int_to_ptr.vmem [resolvable:$false] %s1511_s10 }
  0x22   : > { %s1513_s11 = scalar_lea.vmem %s1512_s10, 256  ;;  %p1514_p11 = scmp.lt.s32.totalorder %s1696_s14, %s1512_s10 }
  0x23   : > { %p1509_p4 = pnand %p1507_p2, %p1493_p3  ;;  %p1515_p5 = scmp.lt.s32.totalorder %s1513_s11, %s1506_s7 }
  0x25   : > { %p1510_p12 = pneg %p1509_p4  ;;  %p1516_p8 = por %p1515_p5, %p1514_p11 }
  0x27   : > { %p1517_p9 = pnand %p1516_p8, %p1510_p12 }
  0x29   : > { %1520 = shalt.err (!%p1517_p9)
}
  0x2a   : > { %1442 = dma.hbm_to_vmem [thread:$0]  (!%p1692_p13), %s1688_s12, 128, %s1696_s14, %s188_s16  }
  0x2b   : > { %p2024_p0 = scmp.lt.s32.totalorder %s1587_s21, 3  ;;  %p2025_p1 = scmp.ge.s32.totalorder %s1587_s21, 1 }
  0x2d   : > { %p205_p3 = pnand %p2025_p1, %p2024_p0 }
  0x2e   : > { %s1730_s13 = sand.u32 (!%p205_p3), 1, %s1579_s19  }
  0x2f   : > { %208 = sbr.rel (%p205_p3) target bundleno = 5821 (0x16bd), region = 40  ;;  %s1411_s17 = sshll.u32 (!%p205_p3), %s1730_s13, 3 }
  0x30   : > { %s211_s23 = scalar_lea.sflag (!%p205_p3), [#allocation3], %s1730_s13  ;;  %s1734_s25 = scalar_lea.vmem (!%p205_p3), [#allocation2], %s1411_s17 }
  0x36   : > { %1566 = dma.done.wait (%p1668_p6), %s211_s23, 128  }
  0x37   : > { %1568 = vsyncadd (%p1668_p6), %s211_s23, 4294967168  ;;  %v240_v0 = vld [vmem:[%s1734_s25] sm:$0xff]  ;;  %vm244_vm2 = vcmask 1043456   ;;  %v1590_v6 = vmov 0   ;;  %v1591_v23 = vmov 2147483647  }
  0x38   : > { %v1741_v1 = vcombine.high %v240_v0, %v240_v0  ;;  %vm257_vm0 = vcmp.ge.s32.totalorder %v240_v0, 0  ;;  %v259_v2 = vxor.u32 2147483647, %v240_v0  ;;  %s1417_s7 = sshll.u32 %s1646_s22, 4  ;;  %s239_s9 = scalar_lea.vmem [#allocation5], %s1730_s13 }
  0x39   : > { %s1338_s10 = sshll.u32 %s239_s9, 4  ;;  %s1968_s23 = scalar_lea.hbm %s2017_s5, %s1417_s7  ;;  %s1970_s10 = int_to_ptr.vmem [resolvable:$true] %s1338_s10 }
  0x3a   : > { %vm258_vm1 = vcmp.ge.s32.totalorder %v1741_v1, 0  ;;  %v260_v3 = vxor.u32 2147483647, %v1741_v1  ;;  %v1745_v4 = vsel %vm257_vm0, %v240_v0, %v259_v2  ;;  %s1521_s29 = scalar_lea.vmem %s1970_s10, 16  ;;  %p2026_p11 = scmp.ne.s32.totalorder %s2021_s30, 0 }
  0x3b   : > { %vm263_vm3 = vcmp.le.s32.totalorder %v1745_v4, 4294967295  ;;  %p1522_p6 = scmp.ne.s32.totalorder %s1970_s10, %s1521_s29  ;;  %s1594_s22 = smov [#allocation5]  }
  0x3c   : > { %v1749_v5 = vsel %vm258_vm1, %v1741_v1, %v260_v3  ;;  %v265_v7 = vsel %vm263_vm3, 1, %v1590_v6  ;;  %s1525_s12 = sshll.u32 %s1594_s22, 4  ;;  %s1526_s12 = int_to_ptr.vmem [resolvable:$false] %s1525_s12 }
  0x3d   : > { %vm264_vm4 = vcmp.le.s32.totalorder %v1749_v5, 4294967295  ;;  %v267_v8 = vsel %vm244_vm2, %v265_v7, 0  ;;  %p1523_p12 = pnand %p1522_p6, %p2026_p11  ;;  %s1527_s14 = scalar_lea.vmem %s1526_s12, 32 }
  0x3e   : > { %v266_v9 = vsel %vm264_vm4, 1, %v1590_v6  ;;  %p1528_p7 = scmp.lt.s32.totalorder %s1970_s10, %s1526_s12  ;;  %p1529_p10 = scmp.lt.s32.totalorder %s1527_s14, %s1521_s29 }
  0x3f   : > { %v268_v10 = vsel %vm244_vm2, %v266_v9, 0  ;;  %p1524_p13 = pneg %p1523_p12 }
  0x40   : > { %v269_v11 = vadd.s32 %v268_v10, %v267_v8  ;;  %p1530_p2 = por %p1529_p10, %p1528_p7 }
  0x42   : > { %v271_v12 = vshrl.u32 %v269_v11, 16  ;;  %v270_v13 = vand.u32 65535, %v269_v11  ;;  %p1531_p4 = pnand %p1530_p2, %p1524_p13 }
  0x44   : > { %v273_v14 = vcvt.s32.f32 %v271_v12  ;;  %v272_v15 = vcvt.s32.f32 %v270_v13 }
  0x46   : > { %276 = vadd.xlane.f32.xlu0 %v273_v14 }
  0x4a   : > { %274 = vadd.xlane.f32.xlu0 %v272_v15 }
  0xd3   : > { %v277_v16 = vpop.xlane.xlu0 %276 }
  0xd4   : > { %v279_v17 = vcvt.f32.s32 %v277_v16 }
  0xd6   : > { %v280_v19 = vshll.u32 %v279_v17, 16 }
  0xd7   : > { %v275_v18 = vpop.xlane.xlu0 %274 }
  0xd8   : > { %v278_v20 = vcvt.f32.s32 %v275_v18 }
  0xda   : > { %v281_v21 = vadd.s32 %v280_v19, %v278_v20 }
  0xdc   : > { %vm282_vm5 = vcmp.ge.s32.totalorder %v281_v21, 128 }
  0xdd   : > { %v283_v22 = vsel %vm282_vm5, 2147483648, %v1590_v6  ;;  %v284_v24 = vsel %vm282_vm5, 4294967295, %v1591_v23 }
  0xde   : > { %v286_v25 = vxor.u32 %v284_v24, %v283_v22  ;;  %v285_v26 = vand.u32 %v284_v24, %v283_v22 }
  0xe0   : > { %v287_v27 = vshra.s32 %v286_v25, 1 }
  0xe2   : > { %v288_v28 = vadd.s32 %v287_v27, %v285_v26 }
  0xe4   : > { %vm289_vm6 = vcmp.le.s32.totalorder %v1745_v4, %v288_v28  ;;  %vm290_vm7 = vcmp.le.s32.totalorder %v1749_v5, %v288_v28  ;;  %v309_v44 = vadd.s32 1, %v288_v28 }
  0xe5   : > { %v291_v29 = vsel %vm289_vm6, 1, %v1590_v6  ;;  %v292_v30 = vsel %vm290_vm7, 1, %v1590_v6 }
  0xe6   : > { %v293_v31 = vsel %vm244_vm2, %v291_v29, 0  ;;  %v294_v32 = vsel %vm244_vm2, %v292_v30, 0 }
  0xe7   : > { %v295_v33 = vadd.s32 %v294_v32, %v293_v31 }
  0xe9   : > { %v297_v34 = vshrl.u32 %v295_v33, 16  ;;  %v296_v36 = vand.u32 65535, %v295_v33 }
  0xeb   : > { %v299_v35 = vcvt.s32.f32 %v297_v34  ;;  %v298_v37 = vcvt.s32.f32 %v296_v36 }
  0xed   : > { %302 = vadd.xlane.f32.xlu1 %v299_v35 }
  0xf1   : > { %300 = vadd.xlane.f32.xlu1 %v298_v37 }
 0x17a   : > { %v303_v38 = vpop.xlane.xlu1 %302 }
 0x17b   : > { %v305_v39 = vcvt.f32.s32 %v303_v38 }
 0x17d   : > { %v306_v41 = vshll.u32 %v305_v39, 16 }
 0x17e   : > { %v301_v40 = vpop.xlane.xlu1 %300 }
 0x17f   : > { %v304_v42 = vcvt.f32.s32 %v301_v40 }
 0x181   : > { %v307_v43 = vadd.s32 %v306_v41, %v304_v42 }
 0x183   : > { %vm308_vm8 = vcmp.ge.s32.totalorder %v307_v43, 128 }
 0x184   : > { %v310_v45 = vsel %vm308_vm8, %v283_v22, %v309_v44  ;;  %v311_v46 = vsel %vm308_vm8, %v288_v28, %v284_v24 }
 0x185   : > { %v313_v47 = vxor.u32 %v311_v46, %v310_v45  ;;  %v312_v48 = vand.u32 %v311_v46, %v310_v45 }
 0x187   : > { %v314_v49 = vshra.s32 %v313_v47, 1 }
 0x189   : > { %v315_v50 = vadd.s32 %v314_v49, %v312_v48 }
 0x18b   : > { %vm316_vm9 = vcmp.le.s32.totalorder %v1745_v4, %v315_v50  ;;  %vm317_vm10 = vcmp.le.s32.totalorder %v1749_v5, %v315_v50  ;;  %v336_v3 = vadd.s32 1, %v315_v50 }
 0x18c   : > { %v318_v51 = vsel %vm316_vm9, 1, %v1590_v6  ;;  %v319_v52 = vsel %vm317_vm10, 1, %v1590_v6 }
 0x18d   : > { %v320_v53 = vsel %vm244_vm2, %v318_v51, 0  ;;  %v321_v54 = vsel %vm244_vm2, %v319_v52, 0 }
 0x18e   : > { %v322_v55 = vadd.s32 %v321_v54, %v320_v53 }
 0x190   : > { %v324_v56 = vshrl.u32 %v322_v55, 16  ;;  %v323_v57 = vand.u32 65535, %v322_v55 }
 0x192   : > { %v326_v58 = vcvt.s32.f32 %v324_v56  ;;  %v325_v59 = vcvt.s32.f32 %v323_v57 }
 0x194   : > { %329 = vadd.xlane.f32.xlu0 %v326_v58  ;;  %327 = vadd.xlane.f32.xlu1 %v325_v59 }
 0x221   : > { %v330_v60 = vpop.xlane.xlu0 %329  ;;  %v328_v61 = vpop.xlane.xlu1 %327 }
 0x222   : > { %v332_v62 = vcvt.f32.s32 %v330_v60  ;;  %v331_v0 = vcvt.f32.s32 %v328_v61 }
 0x224   : > { %v333_v63 = vshll.u32 %v332_v62, 16 }
 0x226   : > { %v334_v2 = vadd.s32 %v333_v63, %v331_v0 }
 0x228   : > { %vm335_vm11 = vcmp.ge.s32.totalorder %v334_v2, 128 }
 0x229   : > { %v337_v7 = vsel %vm335_vm11, %v310_v45, %v336_v3  ;;  %v338_v8 = vsel %vm335_vm11, %v315_v50, %v311_v46 }
 0x22a   : > { %v340_v9 = vxor.u32 %v338_v8, %v337_v7  ;;  %v339_v10 = vand.u32 %v338_v8, %v337_v7 }
 0x22c   : > { %v341_v11 = vshra.s32 %v340_v9, 1 }
 0x22e   : > { %v342_v12 = vadd.s32 %v341_v11, %v339_v10 }
 0x230   : > { %vm343_vm12 = vcmp.le.s32.totalorder %v1745_v4, %v342_v12  ;;  %vm344_vm13 = vcmp.le.s32.totalorder %v1749_v5, %v342_v12  ;;  %v363_v28 = vadd.s32 1, %v342_v12 }
 0x231   : > { %v345_v13 = vsel %vm343_vm12, 1, %v1590_v6  ;;  %v346_v14 = vsel %vm344_vm13, 1, %v1590_v6 }
 0x232   : > { %v347_v15 = vsel %vm244_vm2, %v345_v13, 0  ;;  %v348_v16 = vsel %vm244_vm2, %v346_v14, 0 }
 0x233   : > { %v349_v17 = vadd.s32 %v348_v16, %v347_v15 }
 0x235   : > { %v351_v18 = vshrl.u32 %v349_v17, 16  ;;  %v350_v19 = vand.u32 65535, %v349_v17 }
 0x237   : > { %v353_v20 = vcvt.s32.f32 %v351_v18  ;;  %v352_v21 = vcvt.s32.f32 %v350_v19 }
 0x239   : > { %356 = vadd.xlane.f32.xlu0 %v353_v20  ;;  %354 = vadd.xlane.f32.xlu1 %v352_v21 }
 0x2c6   : > { %v357_v22 = vpop.xlane.xlu0 %356  ;;  %v355_v23 = vpop.xlane.xlu1 %354 }
 0x2c7   : > { %v359_v24 = vcvt.f32.s32 %v357_v22  ;;  %v358_v26 = vcvt.f32.s32 %v355_v23 }
 0x2c9   : > { %v360_v25 = vshll.u32 %v359_v24, 16 }
 0x2cb   : > { %v361_v27 = vadd.s32 %v360_v25, %v358_v26 }
 0x2cd   : > { %vm362_vm14 = vcmp.ge.s32.totalorder %v361_v27, 128 }
 0x2ce   : > { %v364_v29 = vsel %vm362_vm14, %v337_v7, %v363_v28  ;;  %v365_v30 = vsel %vm362_vm14, %v342_v12, %v338_v8 }
 0x2cf   : > { %v367_v31 = vxor.u32 %v365_v30, %v364_v29  ;;  %v366_v32 = vand.u32 %v365_v30, %v364_v29 }
 0x2d1   : > { %v368_v33 = vshra.s32 %v367_v31, 1 }
 0x2d3   : > { %v369_v34 = vadd.s32 %v368_v33, %v366_v32 }
 0x2d5   : > { %vm370_vm15 = vcmp.le.s32.totalorder %v1745_v4, %v369_v34  ;;  %vm371_vm0 = vcmp.le.s32.totalorder %v1749_v5, %v369_v34  ;;  %v390_v50 = vadd.s32 1, %v369_v34 }
 0x2d6   : > { %v372_v35 = vsel %vm370_vm15, 1, %v1590_v6  ;;  %v373_v36 = vsel %vm371_vm0, 1, %v1590_v6 }
 0x2d7   : > { %v374_v37 = vsel %vm244_vm2, %v372_v35, 0  ;;  %v375_v38 = vsel %vm244_vm2, %v373_v36, 0 }
 0x2d8   : > { %v376_v39 = vadd.s32 %v375_v38, %v374_v37 }
 0x2da   : > { %v378_v40 = vshrl.u32 %v376_v39, 16  ;;  %v377_v41 = vand.u32 65535, %v376_v39 }
 0x2dc   : > { %v380_v42 = vcvt.s32.f32 %v378_v40  ;;  %v379_v43 = vcvt.s32.f32 %v377_v41 }
 0x2de   : > { %383 = vadd.xlane.f32.xlu0 %v380_v42  ;;  %381 = vadd.xlane.f32.xlu1 %v379_v43 }
 0x36b   : > { %v384_v44 = vpop.xlane.xlu0 %383  ;;  %v382_v45 = vpop.xlane.xlu1 %381 }
 0x36c   : > { %v386_v46 = vcvt.f32.s32 %v384_v44  ;;  %v385_v48 = vcvt.f32.s32 %v382_v45 }
 0x36e   : > { %v387_v47 = vshll.u32 %v386_v46, 16 }
 0x370   : > { %v388_v49 = vadd.s32 %v387_v47, %v385_v48 }
 0x372   : > { %vm389_vm1 = vcmp.ge.s32.totalorder %v388_v49, 128 }
 0x373   : > { %v391_v51 = vsel %vm389_vm1, %v364_v29, %v390_v50  ;;  %v392_v52 = vsel %vm389_vm1, %v369_v34, %v365_v30 }
 0x374   : > { %v394_v53 = vxor.u32 %v392_v52, %v391_v51  ;;  %v393_v54 = vand.u32 %v392_v52, %v391_v51 }
 0x376   : > { %v395_v55 = vshra.s32 %v394_v53, 1 }
 0x378   : > { %v396_v56 = vadd.s32 %v395_v55, %v393_v54 }
 0x37a   : > { %vm397_vm3 = vcmp.le.s32.totalorder %v1745_v4, %v396_v56  ;;  %vm398_vm4 = vcmp.le.s32.totalorder %v1749_v5, %v396_v56  ;;  %v417_v12 = vadd.s32 1, %v396_v56 }
 0x37b   : > { %v399_v57 = vsel %vm397_vm3, 1, %v1590_v6  ;;  %v400_v58 = vsel %vm398_vm4, 1, %v1590_v6 }
 0x37c   : > { %v401_v59 = vsel %vm244_vm2, %v399_v57, 0  ;;  %v402_v60 = vsel %vm244_vm2, %v400_v58, 0 }
 0x37d   : > { %v403_v61 = vadd.s32 %v402_v60, %v401_v59 }
 0x37f   : > { %v405_v62 = vshrl.u32 %v403_v61, 16  ;;  %v404_v63 = vand.u32 65535, %v403_v61 }
 0x381   : > { %v407_v0 = vcvt.s32.f32 %v405_v62  ;;  %v406_v2 = vcvt.s32.f32 %v404_v63 }
 0x383   : > { %410 = vadd.xlane.f32.xlu0 %v407_v0  ;;  %408 = vadd.xlane.f32.xlu1 %v406_v2 }
 0x410   : > { %v411_v3 = vpop.xlane.xlu0 %410  ;;  %v409_v7 = vpop.xlane.xlu1 %408 }
 0x411   : > { %v413_v8 = vcvt.f32.s32 %v411_v3  ;;  %v412_v10 = vcvt.f32.s32 %v409_v7 }
 0x413   : > { %v414_v9 = vshll.u32 %v413_v8, 16 }
 0x415   : > { %v415_v11 = vadd.s32 %v414_v9, %v412_v10 }
 0x417   : > { %vm416_vm5 = vcmp.ge.s32.totalorder %v415_v11, 128 }
 0x418   : > { %v418_v13 = vsel %vm416_vm5, %v391_v51, %v417_v12  ;;  %v419_v14 = vsel %vm416_vm5, %v396_v56, %v392_v52 }
 0x419   : > { %v421_v15 = vxor.u32 %v419_v14, %v418_v13  ;;  %v420_v16 = vand.u32 %v419_v14, %v418_v13 }
 0x41b   : > { %v422_v17 = vshra.s32 %v421_v15, 1 }
 0x41d   : > { %v423_v18 = vadd.s32 %v422_v17, %v420_v16 }
 0x41f   : > { %vm424_vm6 = vcmp.le.s32.totalorder %v1745_v4, %v423_v18  ;;  %vm425_vm7 = vcmp.le.s32.totalorder %v1749_v5, %v423_v18  ;;  %v444_v34 = vadd.s32 1, %v423_v18 }
 0x420   : > { %v426_v19 = vsel %vm424_vm6, 1, %v1590_v6  ;;  %v427_v20 = vsel %vm425_vm7, 1, %v1590_v6 }
 0x421   : > { %v428_v21 = vsel %vm244_vm2, %v426_v19, 0  ;;  %v429_v22 = vsel %vm244_vm2, %v427_v20, 0 }
 0x422   : > { %v430_v23 = vadd.s32 %v429_v22, %v428_v21 }
 0x424   : > { %v432_v24 = vshrl.u32 %v430_v23, 16  ;;  %v431_v25 = vand.u32 65535, %v430_v23 }
 0x426   : > { %v434_v26 = vcvt.s32.f32 %v432_v24  ;;  %v433_v27 = vcvt.s32.f32 %v431_v25 }
 0x428   : > { %437 = vadd.xlane.f32.xlu0 %v434_v26  ;;  %435 = vadd.xlane.f32.xlu1 %v433_v27 }
 0x4b5   : > { %v438_v28 = vpop.xlane.xlu0 %437  ;;  %v436_v29 = vpop.xlane.xlu1 %435 }
 0x4b6   : > { %v440_v30 = vcvt.f32.s32 %v438_v28  ;;  %v439_v32 = vcvt.f32.s32 %v436_v29 }
 0x4b8   : > { %v441_v31 = vshll.u32 %v440_v30, 16 }
 0x4ba   : > { %v442_v33 = vadd.s32 %v441_v31, %v439_v32 }
 0x4bc   : > { %vm443_vm8 = vcmp.ge.s32.totalorder %v442_v33, 128 }
 0x4bd   : > { %v445_v35 = vsel %vm443_vm8, %v418_v13, %v444_v34  ;;  %v446_v36 = vsel %vm443_vm8, %v423_v18, %v419_v14 }
 0x4be   : > { %v448_v37 = vxor.u32 %v446_v36, %v445_v35  ;;  %v447_v38 = vand.u32 %v446_v36, %v445_v35 }
 0x4c0   : > { %v449_v39 = vshra.s32 %v448_v37, 1 }
 0x4c2   : > { %v450_v40 = vadd.s32 %v449_v39, %v447_v38 }
 0x4c4   : > { %vm451_vm9 = vcmp.le.s32.totalorder %v1745_v4, %v450_v40  ;;  %vm452_vm10 = vcmp.le.s32.totalorder %v1749_v5, %v450_v40  ;;  %v471_v56 = vadd.s32 1, %v450_v40 }
 0x4c5   : > { %v453_v41 = vsel %vm451_vm9, 1, %v1590_v6  ;;  %v454_v42 = vsel %vm452_vm10, 1, %v1590_v6 }
 0x4c6   : > { %v455_v43 = vsel %vm244_vm2, %v453_v41, 0  ;;  %v456_v44 = vsel %vm244_vm2, %v454_v42, 0 }
 0x4c7   : > { %v457_v45 = vadd.s32 %v456_v44, %v455_v43 }
 0x4c9   : > { %v459_v46 = vshrl.u32 %v457_v45, 16  ;;  %v458_v47 = vand.u32 65535, %v457_v45 }
 0x4cb   : > { %v461_v48 = vcvt.s32.f32 %v459_v46  ;;  %v460_v49 = vcvt.s32.f32 %v458_v47 }
 0x4cd   : > { %464 = vadd.xlane.f32.xlu0 %v461_v48  ;;  %462 = vadd.xlane.f32.xlu1 %v460_v49 }
 0x55a   : > { %v465_v50 = vpop.xlane.xlu0 %464  ;;  %v463_v51 = vpop.xlane.xlu1 %462 }
 0x55b   : > { %v467_v52 = vcvt.f32.s32 %v465_v50  ;;  %v466_v54 = vcvt.f32.s32 %v463_v51 }
 0x55d   : > { %v468_v53 = vshll.u32 %v467_v52, 16 }
 0x55f   : > { %v469_v55 = vadd.s32 %v468_v53, %v466_v54 }
 0x561   : > { %vm470_vm11 = vcmp.ge.s32.totalorder %v469_v55, 128 }
 0x562   : > { %v472_v57 = vsel %vm470_vm11, %v445_v35, %v471_v56  ;;  %v473_v58 = vsel %vm470_vm11, %v450_v40, %v446_v36 }
 0x563   : > { %v475_v59 = vxor.u32 %v473_v58, %v472_v57  ;;  %v474_v60 = vand.u32 %v473_v58, %v472_v57 }
 0x565   : > { %v476_v61 = vshra.s32 %v475_v59, 1 }
 0x567   : > { %v477_v62 = vadd.s32 %v476_v61, %v474_v60 }
 0x569   : > { %vm478_vm12 = vcmp.le.s32.totalorder %v1745_v4, %v477_v62  ;;  %vm479_vm13 = vcmp.le.s32.totalorder %v1749_v5, %v477_v62  ;;  %v498_v18 = vadd.s32 1, %v477_v62 }
 0x56a   : > { %v480_v63 = vsel %vm478_vm12, 1, %v1590_v6  ;;  %v481_v0 = vsel %vm479_vm13, 1, %v1590_v6 }
 0x56b   : > { %v482_v2 = vsel %vm244_vm2, %v480_v63, 0  ;;  %v483_v3 = vsel %vm244_vm2, %v481_v0, 0 }
 0x56c   : > { %v484_v7 = vadd.s32 %v483_v3, %v482_v2 }
 0x56e   : > { %v486_v8 = vshrl.u32 %v484_v7, 16  ;;  %v485_v9 = vand.u32 65535, %v484_v7 }
 0x570   : > { %v488_v10 = vcvt.s32.f32 %v486_v8  ;;  %v487_v11 = vcvt.s32.f32 %v485_v9 }
 0x572   : > { %491 = vadd.xlane.f32.xlu0 %v488_v10  ;;  %489 = vadd.xlane.f32.xlu1 %v487_v11 }
 0x5ff   : > { %v492_v12 = vpop.xlane.xlu0 %491  ;;  %v490_v13 = vpop.xlane.xlu1 %489 }
 0x600   : > { %v494_v14 = vcvt.f32.s32 %v492_v12  ;;  %v493_v16 = vcvt.f32.s32 %v490_v13 }
 0x602   : > { %v495_v15 = vshll.u32 %v494_v14, 16 }
 0x604   : > { %v496_v17 = vadd.s32 %v495_v15, %v493_v16 }
 0x606   : > { %vm497_vm14 = vcmp.ge.s32.totalorder %v496_v17, 128 }
 0x607   : > { %v499_v19 = vsel %vm497_vm14, %v472_v57, %v498_v18  ;;  %v500_v20 = vsel %vm497_vm14, %v477_v62, %v473_v58 }
 0x608   : > { %v502_v21 = vxor.u32 %v500_v20, %v499_v19  ;;  %v501_v22 = vand.u32 %v500_v20, %v499_v19 }
 0x60a   : > { %v503_v23 = vshra.s32 %v502_v21, 1 }
 0x60c   : > { %v504_v24 = vadd.s32 %v503_v23, %v501_v22 }
 0x60e   : > { %vm505_vm15 = vcmp.le.s32.totalorder %v1745_v4, %v504_v24  ;;  %vm506_vm0 = vcmp.le.s32.totalorder %v1749_v5, %v504_v24  ;;  %v525_v40 = vadd.s32 1, %v504_v24 }
 0x60f   : > { %v507_v25 = vsel %vm505_vm15, 1, %v1590_v6  ;;  %v508_v26 = vsel %vm506_vm0, 1, %v1590_v6 }
 0x610   : > { %v509_v27 = vsel %vm244_vm2, %v507_v25, 0  ;;  %v510_v28 = vsel %vm244_vm2, %v508_v26, 0 }
 0x611   : > { %v511_v29 = vadd.s32 %v510_v28, %v509_v27 }
 0x613   : > { %v513_v30 = vshrl.u32 %v511_v29, 16  ;;  %v512_v31 = vand.u32 65535, %v511_v29 }
 0x615   : > { %v515_v32 = vcvt.s32.f32 %v513_v30  ;;  %v514_v33 = vcvt.s32.f32 %v512_v31 }
 0x617   : > { %518 = vadd.xlane.f32.xlu0 %v515_v32  ;;  %516 = vadd.xlane.f32.xlu1 %v514_v33 }
 0x6a4   : > { %v519_v34 = vpop.xlane.xlu0 %518  ;;  %v517_v35 = vpop.xlane.xlu1 %516 }
 0x6a5   : > { %v521_v36 = vcvt.f32.s32 %v519_v34  ;;  %v520_v38 = vcvt.f32.s32 %v517_v35 }
 0x6a7   : > { %v522_v37 = vshll.u32 %v521_v36, 16 }
 0x6a9   : > { %v523_v39 = vadd.s32 %v522_v37, %v520_v38 }
 0x6ab   : > { %vm524_vm1 = vcmp.ge.s32.totalorder %v523_v39, 128 }
 0x6ac   : > { %v526_v41 = vsel %vm524_vm1, %v499_v19, %v525_v40  ;;  %v527_v42 = vsel %vm524_vm1, %v504_v24, %v500_v20 }
 0x6ad   : > { %v529_v43 = vxor.u32 %v527_v42, %v526_v41  ;;  %v528_v44 = vand.u32 %v527_v42, %v526_v41 }
 0x6af   : > { %v530_v45 = vshra.s32 %v529_v43, 1 }
 0x6b1   : > { %v531_v46 = vadd.s32 %v530_v45, %v528_v44 }
 0x6b3   : > { %vm532_vm3 = vcmp.le.s32.totalorder %v1745_v4, %v531_v46  ;;  %vm533_vm4 = vcmp.le.s32.totalorder %v1749_v5, %v531_v46  ;;  %v552_v62 = vadd.s32 1, %v531_v46 }
 0x6b4   : > { %v534_v47 = vsel %vm532_vm3, 1, %v1590_v6  ;;  %v535_v48 = vsel %vm533_vm4, 1, %v1590_v6 }
 0x6b5   : > { %v536_v49 = vsel %vm244_vm2, %v534_v47, 0  ;;  %v537_v50 = vsel %vm244_vm2, %v535_v48, 0 }
 0x6b6   : > { %v538_v51 = vadd.s32 %v537_v50, %v536_v49 }
 0x6b8   : > { %v540_v52 = vshrl.u32 %v538_v51, 16  ;;  %v539_v53 = vand.u32 65535, %v538_v51 }
 0x6ba   : > { %v542_v54 = vcvt.s32.f32 %v540_v52  ;;  %v541_v55 = vcvt.s32.f32 %v539_v53 }
 0x6bc   : > { %545 = vadd.xlane.f32.xlu0 %v542_v54  ;;  %543 = vadd.xlane.f32.xlu1 %v541_v55 }
 0x749   : > { %v546_v56 = vpop.xlane.xlu0 %545  ;;  %v544_v57 = vpop.xlane.xlu1 %543 }
 0x74a   : > { %v548_v58 = vcvt.f32.s32 %v546_v56  ;;  %v547_v60 = vcvt.f32.s32 %v544_v57 }
 0x74c   : > { %v549_v59 = vshll.u32 %v548_v58, 16 }
 0x74e   : > { %v550_v61 = vadd.s32 %v549_v59, %v547_v60 }
 0x750   : > { %vm551_vm5 = vcmp.ge.s32.totalorder %v550_v61, 128 }
 0x751   : > { %v553_v63 = vsel %vm551_vm5, %v526_v41, %v552_v62  ;;  %v554_v0 = vsel %vm551_vm5, %v531_v46, %v527_v42 }
 0x752   : > { %v556_v2 = vxor.u32 %v554_v0, %v553_v63  ;;  %v555_v3 = vand.u32 %v554_v0, %v553_v63 }
 0x754   : > { %v557_v7 = vshra.s32 %v556_v2, 1 }
 0x756   : > { %v558_v8 = vadd.s32 %v557_v7, %v555_v3 }
 0x758   : > { %vm559_vm6 = vcmp.le.s32.totalorder %v1745_v4, %v558_v8  ;;  %vm560_vm7 = vcmp.le.s32.totalorder %v1749_v5, %v558_v8  ;;  %v579_v24 = vadd.s32 1, %v558_v8 }
 0x759   : > { %v561_v9 = vsel %vm559_vm6, 1, %v1590_v6  ;;  %v562_v10 = vsel %vm560_vm7, 1, %v1590_v6 }
 0x75a   : > { %v563_v11 = vsel %vm244_vm2, %v561_v9, 0  ;;  %v564_v12 = vsel %vm244_vm2, %v562_v10, 0 }
 0x75b   : > { %v565_v13 = vadd.s32 %v564_v12, %v563_v11 }
 0x75d   : > { %v567_v14 = vshrl.u32 %v565_v13, 16  ;;  %v566_v15 = vand.u32 65535, %v565_v13 }
 0x75f   : > { %v569_v16 = vcvt.s32.f32 %v567_v14  ;;  %v568_v17 = vcvt.s32.f32 %v566_v15 }
 0x761   : > { %572 = vadd.xlane.f32.xlu0 %v569_v16  ;;  %570 = vadd.xlane.f32.xlu1 %v568_v17 }
 0x7ee   : > { %v573_v18 = vpop.xlane.xlu0 %572  ;;  %v571_v19 = vpop.xlane.xlu1 %570 }
 0x7ef   : > { %v575_v20 = vcvt.f32.s32 %v573_v18  ;;  %v574_v22 = vcvt.f32.s32 %v571_v19 }
 0x7f1   : > { %v576_v21 = vshll.u32 %v575_v20, 16 }
 0x7f3   : > { %v577_v23 = vadd.s32 %v576_v21, %v574_v22 }
 0x7f5   : > { %vm578_vm8 = vcmp.ge.s32.totalorder %v577_v23, 128 }
 0x7f6   : > { %v580_v25 = vsel %vm578_vm8, %v553_v63, %v579_v24  ;;  %v581_v26 = vsel %vm578_vm8, %v558_v8, %v554_v0 }
 0x7f7   : > { %v583_v27 = vxor.u32 %v581_v26, %v580_v25  ;;  %v582_v28 = vand.u32 %v581_v26, %v580_v25 }
 0x7f9   : > { %v584_v29 = vshra.s32 %v583_v27, 1 }
 0x7fb   : > { %v585_v30 = vadd.s32 %v584_v29, %v582_v28 }
 0x7fd   : > { %vm586_vm9 = vcmp.le.s32.totalorder %v1745_v4, %v585_v30  ;;  %vm587_vm10 = vcmp.le.s32.totalorder %v1749_v5, %v585_v30  ;;  %v606_v46 = vadd.s32 1, %v585_v30 }
 0x7fe   : > { %v588_v31 = vsel %vm586_vm9, 1, %v1590_v6  ;;  %v589_v32 = vsel %vm587_vm10, 1, %v1590_v6 }
 0x7ff   : > { %v590_v33 = vsel %vm244_vm2, %v588_v31, 0  ;;  %v591_v34 = vsel %vm244_vm2, %v589_v32, 0 }
 0x800   : > { %v592_v35 = vadd.s32 %v591_v34, %v590_v33 }
 0x802   : > { %v594_v36 = vshrl.u32 %v592_v35, 16  ;;  %v593_v37 = vand.u32 65535, %v592_v35 }
 0x804   : > { %v596_v38 = vcvt.s32.f32 %v594_v36  ;;  %v595_v39 = vcvt.s32.f32 %v593_v37 }
 0x806   : > { %599 = vadd.xlane.f32.xlu0 %v596_v38  ;;  %597 = vadd.xlane.f32.xlu1 %v595_v39 }
 0x893   : > { %v600_v40 = vpop.xlane.xlu0 %599  ;;  %v598_v41 = vpop.xlane.xlu1 %597 }
 0x894   : > { %v602_v42 = vcvt.f32.s32 %v600_v40  ;;  %v601_v44 = vcvt.f32.s32 %v598_v41 }
 0x896   : > { %v603_v43 = vshll.u32 %v602_v42, 16 }
 0x898   : > { %v604_v45 = vadd.s32 %v603_v43, %v601_v44 }
 0x89a   : > { %vm605_vm11 = vcmp.ge.s32.totalorder %v604_v45, 128 }
 0x89b   : > { %v607_v47 = vsel %vm605_vm11, %v580_v25, %v606_v46  ;;  %v608_v48 = vsel %vm605_vm11, %v585_v30, %v581_v26 }
 0x89c   : > { %v610_v49 = vxor.u32 %v608_v48, %v607_v47  ;;  %v609_v50 = vand.u32 %v608_v48, %v607_v47 }
 0x89e   : > { %v611_v51 = vshra.s32 %v610_v49, 1 }
 0x8a0   : > { %v612_v52 = vadd.s32 %v611_v51, %v609_v50 }
 0x8a2   : > { %vm613_vm12 = vcmp.le.s32.totalorder %v1745_v4, %v612_v52  ;;  %vm614_vm13 = vcmp.le.s32.totalorder %v1749_v5, %v612_v52  ;;  %v633_v8 = vadd.s32 1, %v612_v52 }
 0x8a3   : > { %v615_v53 = vsel %vm613_vm12, 1, %v1590_v6  ;;  %v616_v54 = vsel %vm614_vm13, 1, %v1590_v6 }
 0x8a4   : > { %v617_v55 = vsel %vm244_vm2, %v615_v53, 0  ;;  %v618_v56 = vsel %vm244_vm2, %v616_v54, 0 }
 0x8a5   : > { %v619_v57 = vadd.s32 %v618_v56, %v617_v55 }
 0x8a7   : > { %v621_v58 = vshrl.u32 %v619_v57, 16  ;;  %v620_v59 = vand.u32 65535, %v619_v57 }
 0x8a9   : > { %v623_v60 = vcvt.s32.f32 %v621_v58  ;;  %v622_v61 = vcvt.s32.f32 %v620_v59 }
 0x8ab   : > { %626 = vadd.xlane.f32.xlu0 %v623_v60  ;;  %624 = vadd.xlane.f32.xlu1 %v622_v61 }
 0x938   : > { %v627_v62 = vpop.xlane.xlu0 %626  ;;  %v625_v63 = vpop.xlane.xlu1 %624 }
 0x939   : > { %v629_v0 = vcvt.f32.s32 %v627_v62  ;;  %v628_v3 = vcvt.f32.s32 %v625_v63 }
 0x93b   : > { %v630_v2 = vshll.u32 %v629_v0, 16 }
 0x93d   : > { %v631_v7 = vadd.s32 %v630_v2, %v628_v3 }
 0x93f   : > { %vm632_vm14 = vcmp.ge.s32.totalorder %v631_v7, 128 }
 0x940   : > { %v634_v9 = vsel %vm632_vm14, %v607_v47, %v633_v8  ;;  %v635_v10 = vsel %vm632_vm14, %v612_v52, %v608_v48 }
 0x941   : > { %v637_v11 = vxor.u32 %v635_v10, %v634_v9  ;;  %v636_v12 = vand.u32 %v635_v10, %v634_v9 }
 0x943   : > { %v638_v13 = vshra.s32 %v637_v11, 1 }
 0x945   : > { %v639_v14 = vadd.s32 %v638_v13, %v636_v12 }
 0x947   : > { %vm640_vm15 = vcmp.le.s32.totalorder %v1745_v4, %v639_v14  ;;  %vm641_vm0 = vcmp.le.s32.totalorder %v1749_v5, %v639_v14  ;;  %v660_v30 = vadd.s32 1, %v639_v14 }
 0x948   : > { %v642_v15 = vsel %vm640_vm15, 1, %v1590_v6  ;;  %v643_v16 = vsel %vm641_vm0, 1, %v1590_v6 }
 0x949   : > { %v644_v17 = vsel %vm244_vm2, %v642_v15, 0  ;;  %v645_v18 = vsel %vm244_vm2, %v643_v16, 0 }
 0x94a   : > { %v646_v19 = vadd.s32 %v645_v18, %v644_v17 }
 0x94c   : > { %v648_v20 = vshrl.u32 %v646_v19, 16  ;;  %v647_v21 = vand.u32 65535, %v646_v19 }
 0x94e   : > { %v650_v22 = vcvt.s32.f32 %v648_v20  ;;  %v649_v23 = vcvt.s32.f32 %v647_v21 }
 0x950   : > { %653 = vadd.xlane.f32.xlu0 %v650_v22  ;;  %651 = vadd.xlane.f32.xlu1 %v649_v23 }
 0x9dd   : > { %v654_v24 = vpop.xlane.xlu0 %653  ;;  %v652_v25 = vpop.xlane.xlu1 %651 }
 0x9de   : > { %v656_v26 = vcvt.f32.s32 %v654_v24  ;;  %v655_v28 = vcvt.f32.s32 %v652_v25 }
 0x9e0   : > { %v657_v27 = vshll.u32 %v656_v26, 16 }
 0x9e2   : > { %v658_v29 = vadd.s32 %v657_v27, %v655_v28 }
 0x9e4   : > { %vm659_vm1 = vcmp.ge.s32.totalorder %v658_v29, 128 }
 0x9e5   : > { %v661_v31 = vsel %vm659_vm1, %v634_v9, %v660_v30  ;;  %v662_v32 = vsel %vm659_vm1, %v639_v14, %v635_v10 }
 0x9e6   : > { %v664_v33 = vxor.u32 %v662_v32, %v661_v31  ;;  %v663_v34 = vand.u32 %v662_v32, %v661_v31 }
 0x9e8   : > { %v665_v35 = vshra.s32 %v664_v33, 1 }
 0x9ea   : > { %v666_v36 = vadd.s32 %v665_v35, %v663_v34 }
 0x9ec   : > { %vm667_vm3 = vcmp.le.s32.totalorder %v1745_v4, %v666_v36  ;;  %vm668_vm4 = vcmp.le.s32.totalorder %v1749_v5, %v666_v36  ;;  %v687_v52 = vadd.s32 1, %v666_v36 }
 0x9ed   : > { %v669_v37 = vsel %vm667_vm3, 1, %v1590_v6  ;;  %v670_v38 = vsel %vm668_vm4, 1, %v1590_v6 }
 0x9ee   : > { %v671_v39 = vsel %vm244_vm2, %v669_v37, 0  ;;  %v672_v40 = vsel %vm244_vm2, %v670_v38, 0 }
 0x9ef   : > { %v673_v41 = vadd.s32 %v672_v40, %v671_v39 }
 0x9f1   : > { %v675_v42 = vshrl.u32 %v673_v41, 16  ;;  %v674_v43 = vand.u32 65535, %v673_v41 }
 0x9f3   : > { %v677_v44 = vcvt.s32.f32 %v675_v42  ;;  %v676_v45 = vcvt.s32.f32 %v674_v43 }
 0x9f5   : > { %680 = vadd.xlane.f32.xlu0 %v677_v44  ;;  %678 = vadd.xlane.f32.xlu1 %v676_v45 }
 0xa82   : > { %v681_v46 = vpop.xlane.xlu0 %680  ;;  %v679_v47 = vpop.xlane.xlu1 %678 }
 0xa83   : > { %v683_v48 = vcvt.f32.s32 %v681_v46  ;;  %v682_v50 = vcvt.f32.s32 %v679_v47 }
 0xa85   : > { %v684_v49 = vshll.u32 %v683_v48, 16 }
 0xa87   : > { %v685_v51 = vadd.s32 %v684_v49, %v682_v50 }
 0xa89   : > { %vm686_vm5 = vcmp.ge.s32.totalorder %v685_v51, 128 }
 0xa8a   : > { %v688_v53 = vsel %vm686_vm5, %v661_v31, %v687_v52  ;;  %v689_v54 = vsel %vm686_vm5, %v666_v36, %v662_v32 }
 0xa8b   : > { %v691_v55 = vxor.u32 %v689_v54, %v688_v53  ;;  %v690_v56 = vand.u32 %v689_v54, %v688_v53 }
 0xa8d   : > { %v692_v57 = vshra.s32 %v691_v55, 1 }
 0xa8f   : > { %v693_v58 = vadd.s32 %v692_v57, %v690_v56 }
 0xa91   : > { %vm694_vm6 = vcmp.le.s32.totalorder %v1745_v4, %v693_v58  ;;  %vm695_vm7 = vcmp.le.s32.totalorder %v1749_v5, %v693_v58  ;;  %v714_v14 = vadd.s32 1, %v693_v58 }
 0xa92   : > { %v696_v59 = vsel %vm694_vm6, 1, %v1590_v6  ;;  %v697_v60 = vsel %vm695_vm7, 1, %v1590_v6 }
 0xa93   : > { %v698_v61 = vsel %vm244_vm2, %v696_v59, 0  ;;  %v699_v62 = vsel %vm244_vm2, %v697_v60, 0 }
 0xa94   : > { %v700_v63 = vadd.s32 %v699_v62, %v698_v61 }
 0xa96   : > { %v702_v0 = vshrl.u32 %v700_v63, 16  ;;  %v701_v2 = vand.u32 65535, %v700_v63 }
 0xa98   : > { %v704_v3 = vcvt.s32.f32 %v702_v0  ;;  %v703_v7 = vcvt.s32.f32 %v701_v2 }
 0xa9a   : > { %707 = vadd.xlane.f32.xlu0 %v704_v3  ;;  %705 = vadd.xlane.f32.xlu1 %v703_v7 }
 0xb27   : > { %v708_v8 = vpop.xlane.xlu0 %707  ;;  %v706_v9 = vpop.xlane.xlu1 %705 }
 0xb28   : > { %v710_v10 = vcvt.f32.s32 %v708_v8  ;;  %v709_v12 = vcvt.f32.s32 %v706_v9 }
 0xb2a   : > { %v711_v11 = vshll.u32 %v710_v10, 16 }
 0xb2c   : > { %v712_v13 = vadd.s32 %v711_v11, %v709_v12 }
 0xb2e   : > { %vm713_vm8 = vcmp.ge.s32.totalorder %v712_v13, 128 }
 0xb2f   : > { %v715_v15 = vsel %vm713_vm8, %v688_v53, %v714_v14  ;;  %v716_v16 = vsel %vm713_vm8, %v693_v58, %v689_v54 }
 0xb30   : > { %v718_v17 = vxor.u32 %v716_v16, %v715_v15  ;;  %v717_v18 = vand.u32 %v716_v16, %v715_v15 }
 0xb32   : > { %v719_v19 = vshra.s32 %v718_v17, 1 }
 0xb34   : > { %v720_v20 = vadd.s32 %v719_v19, %v717_v18 }
 0xb36   : > { %vm721_vm9 = vcmp.le.s32.totalorder %v1745_v4, %v720_v20  ;;  %vm722_vm10 = vcmp.le.s32.totalorder %v1749_v5, %v720_v20  ;;  %v741_v36 = vadd.s32 1, %v720_v20 }
 0xb37   : > { %v723_v21 = vsel %vm721_vm9, 1, %v1590_v6  ;;  %v724_v22 = vsel %vm722_vm10, 1, %v1590_v6 }
 0xb38   : > { %v725_v23 = vsel %vm244_vm2, %v723_v21, 0  ;;  %v726_v24 = vsel %vm244_vm2, %v724_v22, 0 }
 0xb39   : > { %v727_v25 = vadd.s32 %v726_v24, %v725_v23 }
 0xb3b   : > { %v729_v26 = vshrl.u32 %v727_v25, 16  ;;  %v728_v27 = vand.u32 65535, %v727_v25 }
 0xb3d   : > { %v731_v28 = vcvt.s32.f32 %v729_v26  ;;  %v730_v29 = vcvt.s32.f32 %v728_v27 }
 0xb3f   : > { %734 = vadd.xlane.f32.xlu0 %v731_v28  ;;  %732 = vadd.xlane.f32.xlu1 %v730_v29 }
 0xbcc   : > { %v735_v30 = vpop.xlane.xlu0 %734  ;;  %v733_v31 = vpop.xlane.xlu1 %732 }
 0xbcd   : > { %v737_v32 = vcvt.f32.s32 %v735_v30  ;;  %v736_v34 = vcvt.f32.s32 %v733_v31 }
 0xbcf   : > { %v738_v33 = vshll.u32 %v737_v32, 16 }
 0xbd1   : > { %v739_v35 = vadd.s32 %v738_v33, %v736_v34 }
 0xbd3   : > { %vm740_vm11 = vcmp.ge.s32.totalorder %v739_v35, 128 }
 0xbd4   : > { %v742_v37 = vsel %vm740_vm11, %v715_v15, %v741_v36  ;;  %v743_v38 = vsel %vm740_vm11, %v720_v20, %v716_v16 }
 0xbd5   : > { %v745_v39 = vxor.u32 %v743_v38, %v742_v37  ;;  %v744_v40 = vand.u32 %v743_v38, %v742_v37 }
 0xbd7   : > { %v746_v41 = vshra.s32 %v745_v39, 1 }
 0xbd9   : > { %v747_v42 = vadd.s32 %v746_v41, %v744_v40 }
 0xbdb   : > { %vm748_vm12 = vcmp.le.s32.totalorder %v1745_v4, %v747_v42  ;;  %vm749_vm13 = vcmp.le.s32.totalorder %v1749_v5, %v747_v42  ;;  %v768_v58 = vadd.s32 1, %v747_v42 }
 0xbdc   : > { %v750_v43 = vsel %vm748_vm12, 1, %v1590_v6  ;;  %v751_v44 = vsel %vm749_vm13, 1, %v1590_v6 }
 0xbdd   : > { %v752_v45 = vsel %vm244_vm2, %v750_v43, 0  ;;  %v753_v46 = vsel %vm244_vm2, %v751_v44, 0 }
 0xbde   : > { %v754_v47 = vadd.s32 %v753_v46, %v752_v45 }
 0xbe0   : > { %v756_v48 = vshrl.u32 %v754_v47, 16  ;;  %v755_v49 = vand.u32 65535, %v754_v47 }
 0xbe2   : > { %v758_v50 = vcvt.s32.f32 %v756_v48  ;;  %v757_v51 = vcvt.s32.f32 %v755_v49 }
 0xbe4   : > { %761 = vadd.xlane.f32.xlu0 %v758_v50  ;;  %759 = vadd.xlane.f32.xlu1 %v757_v51 }
 0xc71   : > { %v762_v52 = vpop.xlane.xlu0 %761  ;;  %v760_v53 = vpop.xlane.xlu1 %759 }
 0xc72   : > { %v764_v54 = vcvt.f32.s32 %v762_v52  ;;  %v763_v56 = vcvt.f32.s32 %v760_v53 }
 0xc74   : > { %v765_v55 = vshll.u32 %v764_v54, 16 }
 0xc76   : > { %v766_v57 = vadd.s32 %v765_v55, %v763_v56 }
 0xc78   : > { %vm767_vm14 = vcmp.ge.s32.totalorder %v766_v57, 128 }
 0xc79   : > { %v769_v59 = vsel %vm767_vm14, %v742_v37, %v768_v58  ;;  %v770_v60 = vsel %vm767_vm14, %v747_v42, %v743_v38 }
 0xc7a   : > { %v772_v61 = vxor.u32 %v770_v60, %v769_v59  ;;  %v771_v62 = vand.u32 %v770_v60, %v769_v59 }
 0xc7c   : > { %v773_v63 = vshra.s32 %v772_v61, 1 }
 0xc7e   : > { %v774_v0 = vadd.s32 %v773_v63, %v771_v62 }
 0xc80   : > { %vm775_vm15 = vcmp.le.s32.totalorder %v1745_v4, %v774_v0  ;;  %vm776_vm0 = vcmp.le.s32.totalorder %v1749_v5, %v774_v0  ;;  %v795_v20 = vadd.s32 1, %v774_v0 }
 0xc81   : > { %v777_v2 = vsel %vm775_vm15, 1, %v1590_v6  ;;  %v778_v3 = vsel %vm776_vm0, 1, %v1590_v6 }
 0xc82   : > { %v779_v7 = vsel %vm244_vm2, %v777_v2, 0  ;;  %v780_v8 = vsel %vm244_vm2, %v778_v3, 0 }
 0xc83   : > { %v781_v9 = vadd.s32 %v780_v8, %v779_v7 }
 0xc85   : > { %v783_v10 = vshrl.u32 %v781_v9, 16  ;;  %v782_v11 = vand.u32 65535, %v781_v9 }
 0xc87   : > { %v785_v12 = vcvt.s32.f32 %v783_v10  ;;  %v784_v13 = vcvt.s32.f32 %v782_v11 }
 0xc89   : > { %788 = vadd.xlane.f32.xlu0 %v785_v12  ;;  %786 = vadd.xlane.f32.xlu1 %v784_v13 }
 0xd16   : > { %v789_v14 = vpop.xlane.xlu0 %788  ;;  %v787_v15 = vpop.xlane.xlu1 %786 }
 0xd17   : > { %v791_v16 = vcvt.f32.s32 %v789_v14  ;;  %v790_v18 = vcvt.f32.s32 %v787_v15 }
 0xd19   : > { %v792_v17 = vshll.u32 %v791_v16, 16 }
 0xd1b   : > { %v793_v19 = vadd.s32 %v792_v17, %v790_v18 }
 0xd1d   : > { %vm794_vm1 = vcmp.ge.s32.totalorder %v793_v19, 128 }
 0xd1e   : > { %v796_v21 = vsel %vm794_vm1, %v769_v59, %v795_v20  ;;  %v797_v22 = vsel %vm794_vm1, %v774_v0, %v770_v60 }
 0xd1f   : > { %v799_v23 = vxor.u32 %v797_v22, %v796_v21  ;;  %v798_v24 = vand.u32 %v797_v22, %v796_v21 }
 0xd21   : > { %v800_v25 = vshra.s32 %v799_v23, 1 }
 0xd23   : > { %v801_v26 = vadd.s32 %v800_v25, %v798_v24 }
 0xd25   : > { %vm802_vm3 = vcmp.le.s32.totalorder %v1745_v4, %v801_v26  ;;  %vm803_vm4 = vcmp.le.s32.totalorder %v1749_v5, %v801_v26  ;;  %v822_v42 = vadd.s32 1, %v801_v26 }
 0xd26   : > { %v804_v27 = vsel %vm802_vm3, 1, %v1590_v6  ;;  %v805_v28 = vsel %vm803_vm4, 1, %v1590_v6 }
 0xd27   : > { %v806_v29 = vsel %vm244_vm2, %v804_v27, 0  ;;  %v807_v30 = vsel %vm244_vm2, %v805_v28, 0 }
 0xd28   : > { %v808_v31 = vadd.s32 %v807_v30, %v806_v29 }
 0xd2a   : > { %v810_v32 = vshrl.u32 %v808_v31, 16  ;;  %v809_v33 = vand.u32 65535, %v808_v31 }
 0xd2c   : > { %v812_v34 = vcvt.s32.f32 %v810_v32  ;;  %v811_v35 = vcvt.s32.f32 %v809_v33 }
 0xd2e   : > { %815 = vadd.xlane.f32.xlu0 %v812_v34  ;;  %813 = vadd.xlane.f32.xlu1 %v811_v35 }
 0xdbb   : > { %v816_v36 = vpop.xlane.xlu0 %815  ;;  %v814_v37 = vpop.xlane.xlu1 %813 }
 0xdbc   : > { %v818_v38 = vcvt.f32.s32 %v816_v36  ;;  %v817_v40 = vcvt.f32.s32 %v814_v37 }
 0xdbe   : > { %v819_v39 = vshll.u32 %v818_v38, 16 }
 0xdc0   : > { %v820_v41 = vadd.s32 %v819_v39, %v817_v40 }
 0xdc2   : > { %vm821_vm5 = vcmp.ge.s32.totalorder %v820_v41, 128 }
 0xdc3   : > { %v823_v43 = vsel %vm821_vm5, %v796_v21, %v822_v42  ;;  %v824_v44 = vsel %vm821_vm5, %v801_v26, %v797_v22 }
 0xdc4   : > { %v826_v45 = vxor.u32 %v824_v44, %v823_v43  ;;  %v825_v46 = vand.u32 %v824_v44, %v823_v43 }
 0xdc6   : > { %v827_v47 = vshra.s32 %v826_v45, 1 }
 0xdc8   : > { %v828_v48 = vadd.s32 %v827_v47, %v825_v46 }
 0xdca   : > { %vm829_vm6 = vcmp.le.s32.totalorder %v1745_v4, %v828_v48  ;;  %vm830_vm7 = vcmp.le.s32.totalorder %v1749_v5, %v828_v48  ;;  %v849_v0 = vadd.s32 1, %v828_v48 }
 0xdcb   : > { %v831_v49 = vsel %vm829_vm6, 1, %v1590_v6  ;;  %v832_v50 = vsel %vm830_vm7, 1, %v1590_v6 }
 0xdcc   : > { %v833_v51 = vsel %vm244_vm2, %v831_v49, 0  ;;  %v834_v52 = vsel %vm244_vm2, %v832_v50, 0 }
 0xdcd   : > { %v835_v53 = vadd.s32 %v834_v52, %v833_v51 }
 0xdcf   : > { %v837_v54 = vshrl.u32 %v835_v53, 16  ;;  %v836_v55 = vand.u32 65535, %v835_v53 }
 0xdd1   : > { %v839_v56 = vcvt.s32.f32 %v837_v54  ;;  %v838_v57 = vcvt.s32.f32 %v836_v55 }
 0xdd3   : > { %842 = vadd.xlane.f32.xlu0 %v839_v56  ;;  %840 = vadd.xlane.f32.xlu1 %v838_v57 }
 0xe60   : > { %v843_v58 = vpop.xlane.xlu0 %842  ;;  %v841_v59 = vpop.xlane.xlu1 %840 }
 0xe61   : > { %v845_v60 = vcvt.f32.s32 %v843_v58  ;;  %v844_v62 = vcvt.f32.s32 %v841_v59 }
 0xe63   : > { %v846_v61 = vshll.u32 %v845_v60, 16 }
 0xe65   : > { %v847_v63 = vadd.s32 %v846_v61, %v844_v62 }
 0xe67   : > { %vm848_vm8 = vcmp.ge.s32.totalorder %v847_v63, 128 }
 0xe68   : > { %v850_v2 = vsel %vm848_vm8, %v823_v43, %v849_v0  ;;  %v851_v3 = vsel %vm848_vm8, %v828_v48, %v824_v44 }
 0xe69   : > { %v853_v7 = vxor.u32 %v851_v3, %v850_v2  ;;  %v852_v8 = vand.u32 %v851_v3, %v850_v2 }
 0xe6b   : > { %v854_v9 = vshra.s32 %v853_v7, 1 }
 0xe6d   : > { %v855_v10 = vadd.s32 %v854_v9, %v852_v8 }
 0xe6f   : > { %vm856_vm9 = vcmp.le.s32.totalorder %v1745_v4, %v855_v10  ;;  %vm857_vm10 = vcmp.le.s32.totalorder %v1749_v5, %v855_v10  ;;  %v876_v26 = vadd.s32 1, %v855_v10 }
 0xe70   : > { %v858_v11 = vsel %vm856_vm9, 1, %v1590_v6  ;;  %v859_v12 = vsel %vm857_vm10, 1, %v1590_v6 }
 0xe71   : > { %v860_v13 = vsel %vm244_vm2, %v858_v11, 0  ;;  %v861_v14 = vsel %vm244_vm2, %v859_v12, 0 }
 0xe72   : > { %v862_v15 = vadd.s32 %v861_v14, %v860_v13 }
 0xe74   : > { %v864_v16 = vshrl.u32 %v862_v15, 16  ;;  %v863_v17 = vand.u32 65535, %v862_v15 }
 0xe76   : > { %v866_v18 = vcvt.s32.f32 %v864_v16  ;;  %v865_v19 = vcvt.s32.f32 %v863_v17 }
 0xe78   : > { %869 = vadd.xlane.f32.xlu0 %v866_v18  ;;  %867 = vadd.xlane.f32.xlu1 %v865_v19 }
 0xf05   : > { %v870_v20 = vpop.xlane.xlu0 %869  ;;  %v868_v21 = vpop.xlane.xlu1 %867 }
 0xf06   : > { %v872_v22 = vcvt.f32.s32 %v870_v20  ;;  %v871_v24 = vcvt.f32.s32 %v868_v21 }
 0xf08   : > { %v873_v23 = vshll.u32 %v872_v22, 16 }
 0xf0a   : > { %v874_v25 = vadd.s32 %v873_v23, %v871_v24 }
 0xf0c   : > { %vm875_vm11 = vcmp.ge.s32.totalorder %v874_v25, 128 }
 0xf0d   : > { %v877_v27 = vsel %vm875_vm11, %v850_v2, %v876_v26  ;;  %v878_v28 = vsel %vm875_vm11, %v855_v10, %v851_v3 }
 0xf0e   : > { %v880_v29 = vxor.u32 %v878_v28, %v877_v27  ;;  %v879_v30 = vand.u32 %v878_v28, %v877_v27 }
 0xf10   : > { %v881_v31 = vshra.s32 %v880_v29, 1 }
 0xf12   : > { %v882_v32 = vadd.s32 %v881_v31, %v879_v30 }
 0xf14   : > { %vm883_vm12 = vcmp.le.s32.totalorder %v1745_v4, %v882_v32  ;;  %vm884_vm13 = vcmp.le.s32.totalorder %v1749_v5, %v882_v32  ;;  %v903_v48 = vadd.s32 1, %v882_v32 }
 0xf15   : > { %v885_v33 = vsel %vm883_vm12, 1, %v1590_v6  ;;  %v886_v34 = vsel %vm884_vm13, 1, %v1590_v6 }
 0xf16   : > { %v887_v35 = vsel %vm244_vm2, %v885_v33, 0  ;;  %v888_v36 = vsel %vm244_vm2, %v886_v34, 0 }
 0xf17   : > { %v889_v37 = vadd.s32 %v888_v36, %v887_v35 }
 0xf19   : > { %v891_v38 = vshrl.u32 %v889_v37, 16  ;;  %v890_v39 = vand.u32 65535, %v889_v37 }
 0xf1b   : > { %v893_v40 = vcvt.s32.f32 %v891_v38  ;;  %v892_v41 = vcvt.s32.f32 %v890_v39 }
 0xf1d   : > { %896 = vadd.xlane.f32.xlu0 %v893_v40  ;;  %894 = vadd.xlane.f32.xlu1 %v892_v41 }
 0xfaa   : > { %v897_v42 = vpop.xlane.xlu0 %896  ;;  %v895_v43 = vpop.xlane.xlu1 %894 }
 0xfab   : > { %v899_v44 = vcvt.f32.s32 %v897_v42  ;;  %v898_v46 = vcvt.f32.s32 %v895_v43 }
 0xfad   : > { %v900_v45 = vshll.u32 %v899_v44, 16 }
 0xfaf   : > { %v901_v47 = vadd.s32 %v900_v45, %v898_v46 }
 0xfb1   : > { %vm902_vm14 = vcmp.ge.s32.totalorder %v901_v47, 128 }
 0xfb2   : > { %v904_v49 = vsel %vm902_vm14, %v877_v27, %v903_v48  ;;  %v905_v50 = vsel %vm902_vm14, %v882_v32, %v878_v28 }
 0xfb3   : > { %v907_v51 = vxor.u32 %v905_v50, %v904_v49  ;;  %v906_v52 = vand.u32 %v905_v50, %v904_v49 }
 0xfb5   : > { %v908_v53 = vshra.s32 %v907_v51, 1 }
 0xfb7   : > { %v909_v54 = vadd.s32 %v908_v53, %v906_v52 }
 0xfb9   : > { %vm910_vm15 = vcmp.le.s32.totalorder %v1745_v4, %v909_v54  ;;  %vm911_vm0 = vcmp.le.s32.totalorder %v1749_v5, %v909_v54  ;;  %v930_v10 = vadd.s32 1, %v909_v54 }
 0xfba   : > { %v912_v55 = vsel %vm910_vm15, 1, %v1590_v6  ;;  %v913_v56 = vsel %vm911_vm0, 1, %v1590_v6 }
 0xfbb   : > { %v914_v57 = vsel %vm244_vm2, %v912_v55, 0  ;;  %v915_v58 = vsel %vm244_vm2, %v913_v56, 0 }
 0xfbc   : > { %v916_v59 = vadd.s32 %v915_v58, %v914_v57 }
 0xfbe   : > { %v918_v60 = vshrl.u32 %v916_v59, 16  ;;  %v917_v61 = vand.u32 65535, %v916_v59 }
 0xfc0   : > { %v920_v62 = vcvt.s32.f32 %v918_v60  ;;  %v919_v63 = vcvt.s32.f32 %v917_v61 }
 0xfc2   : > { %923 = vadd.xlane.f32.xlu0 %v920_v62  ;;  %921 = vadd.xlane.f32.xlu1 %v919_v63 }
0x104f   : > { %v924_v0 = vpop.xlane.xlu0 %923  ;;  %v922_v2 = vpop.xlane.xlu1 %921 }
0x1050   : > { %v926_v3 = vcvt.f32.s32 %v924_v0  ;;  %v925_v8 = vcvt.f32.s32 %v922_v2 }
0x1052   : > { %v927_v7 = vshll.u32 %v926_v3, 16 }
0x1054   : > { %v928_v9 = vadd.s32 %v927_v7, %v925_v8 }
0x1056   : > { %vm929_vm1 = vcmp.ge.s32.totalorder %v928_v9, 128 }
0x1057   : > { %v931_v11 = vsel %vm929_vm1, %v904_v49, %v930_v10  ;;  %v932_v12 = vsel %vm929_vm1, %v909_v54, %v905_v50 }
0x1058   : > { %v934_v13 = vxor.u32 %v932_v12, %v931_v11  ;;  %v933_v14 = vand.u32 %v932_v12, %v931_v11 }
0x105a   : > { %v935_v15 = vshra.s32 %v934_v13, 1 }
0x105c   : > { %v936_v16 = vadd.s32 %v935_v15, %v933_v14 }
0x105e   : > { %vm937_vm3 = vcmp.le.s32.totalorder %v1745_v4, %v936_v16  ;;  %vm938_vm4 = vcmp.le.s32.totalorder %v1749_v5, %v936_v16  ;;  %v957_v32 = vadd.s32 1, %v936_v16 }
0x105f   : > { %v939_v17 = vsel %vm937_vm3, 1, %v1590_v6  ;;  %v940_v18 = vsel %vm938_vm4, 1, %v1590_v6 }
0x1060   : > { %v941_v19 = vsel %vm244_vm2, %v939_v17, 0  ;;  %v942_v20 = vsel %vm244_vm2, %v940_v18, 0 }
0x1061   : > { %v943_v21 = vadd.s32 %v942_v20, %v941_v19 }
0x1063   : > { %v945_v22 = vshrl.u32 %v943_v21, 16  ;;  %v944_v23 = vand.u32 65535, %v943_v21 }
0x1065   : > { %v947_v24 = vcvt.s32.f32 %v945_v22  ;;  %v946_v25 = vcvt.s32.f32 %v944_v23 }
0x1067   : > { %950 = vadd.xlane.f32.xlu0 %v947_v24  ;;  %948 = vadd.xlane.f32.xlu1 %v946_v25 }
0x10f4   : > { %v951_v26 = vpop.xlane.xlu0 %950  ;;  %v949_v27 = vpop.xlane.xlu1 %948 }
0x10f5   : > { %v953_v28 = vcvt.f32.s32 %v951_v26  ;;  %v952_v30 = vcvt.f32.s32 %v949_v27 }
0x10f7   : > { %v954_v29 = vshll.u32 %v953_v28, 16 }
0x10f9   : > { %v955_v31 = vadd.s32 %v954_v29, %v952_v30 }
0x10fb   : > { %vm956_vm5 = vcmp.ge.s32.totalorder %v955_v31, 128 }
0x10fc   : > { %v958_v33 = vsel %vm956_vm5, %v931_v11, %v957_v32  ;;  %v959_v34 = vsel %vm956_vm5, %v936_v16, %v932_v12 }
0x10fd   : > { %v961_v35 = vxor.u32 %v959_v34, %v958_v33  ;;  %v960_v36 = vand.u32 %v959_v34, %v958_v33 }
0x10ff   : > { %v962_v37 = vshra.s32 %v961_v35, 1 }
0x1101   : > { %v963_v38 = vadd.s32 %v962_v37, %v960_v36 }
0x1103   : > { %vm964_vm6 = vcmp.le.s32.totalorder %v1745_v4, %v963_v38  ;;  %vm965_vm7 = vcmp.le.s32.totalorder %v1749_v5, %v963_v38  ;;  %v984_v54 = vadd.s32 1, %v963_v38 }
0x1104   : > { %v966_v39 = vsel %vm964_vm6, 1, %v1590_v6  ;;  %v967_v40 = vsel %vm965_vm7, 1, %v1590_v6 }
0x1105   : > { %v968_v41 = vsel %vm244_vm2, %v966_v39, 0  ;;  %v969_v42 = vsel %vm244_vm2, %v967_v40, 0 }
0x1106   : > { %v970_v43 = vadd.s32 %v969_v42, %v968_v41 }
0x1108   : > { %v972_v44 = vshrl.u32 %v970_v43, 16  ;;  %v971_v45 = vand.u32 65535, %v970_v43 }
0x110a   : > { %v974_v46 = vcvt.s32.f32 %v972_v44  ;;  %v973_v47 = vcvt.s32.f32 %v971_v45 }
0x110c   : > { %977 = vadd.xlane.f32.xlu0 %v974_v46  ;;  %975 = vadd.xlane.f32.xlu1 %v973_v47 }
0x1199   : > { %v978_v48 = vpop.xlane.xlu0 %977  ;;  %v976_v49 = vpop.xlane.xlu1 %975 }
0x119a   : > { %v980_v50 = vcvt.f32.s32 %v978_v48  ;;  %v979_v52 = vcvt.f32.s32 %v976_v49 }
0x119c   : > { %v981_v51 = vshll.u32 %v980_v50, 16 }
0x119e   : > { %v982_v53 = vadd.s32 %v981_v51, %v979_v52 }
0x11a0   : > { %vm983_vm8 = vcmp.ge.s32.totalorder %v982_v53, 128 }
0x11a1   : > { %v985_v55 = vsel %vm983_vm8, %v958_v33, %v984_v54  ;;  %v986_v56 = vsel %vm983_vm8, %v963_v38, %v959_v34  ;;  %vm1593_vm8 = vmmov 0  }
0x11a2   : > { %v988_v57 = vxor.u32 %v986_v56, %v985_v55  ;;  %v987_v58 = vand.u32 %v986_v56, %v985_v55 }
0x11a4   : > { %v989_v59 = vshra.s32 %v988_v57, 1 }
0x11a6   : > { %v990_v60 = vadd.s32 %v989_v59, %v987_v58 }
0x11a8   : > { %vm991_vm9 = vcmp.le.s32.totalorder %v1745_v4, %v990_v60  ;;  %vm992_vm10 = vcmp.le.s32.totalorder %v1749_v5, %v990_v60  ;;  %v1011_v16 = vadd.s32 1, %v990_v60 }
0x11a9   : > { %v993_v61 = vsel %vm991_vm9, 1, %v1590_v6  ;;  %v994_v62 = vsel %vm992_vm10, 1, %v1590_v6 }
0x11aa   : > { %v995_v63 = vsel %vm244_vm2, %v993_v61, 0  ;;  %v996_v0 = vsel %vm244_vm2, %v994_v62, 0 }
0x11ab   : > { %v997_v2 = vadd.s32 %v996_v0, %v995_v63 }
0x11ad   : > { %v999_v3 = vshrl.u32 %v997_v2, 16  ;;  %v998_v7 = vand.u32 65535, %v997_v2 }
0x11af   : > { %v1001_v8 = vcvt.s32.f32 %v999_v3  ;;  %v1000_v9 = vcvt.s32.f32 %v998_v7 }
0x11b1   : > { %1004 = vadd.xlane.f32.xlu0 %v1001_v8  ;;  %1002 = vadd.xlane.f32.xlu1 %v1000_v9 }
0x123e   : > { %v1005_v10 = vpop.xlane.xlu0 %1004  ;;  %v1003_v11 = vpop.xlane.xlu1 %1002 }
0x123f   : > { %v1007_v12 = vcvt.f32.s32 %v1005_v10  ;;  %v1006_v14 = vcvt.f32.s32 %v1003_v11 }
0x1241   : > { %v1008_v13 = vshll.u32 %v1007_v12, 16 }
0x1243   : > { %v1009_v15 = vadd.s32 %v1008_v13, %v1006_v14 }
0x1245   : > { %vm1010_vm11 = vcmp.ge.s32.totalorder %v1009_v15, 128 }
0x1246   : > { %v1012_v17 = vsel %vm1010_vm11, %v985_v55, %v1011_v16  ;;  %v1013_v18 = vsel %vm1010_vm11, %v990_v60, %v986_v56  ;;  %vm1145_vm11 = vcmask 1041408  }
0x1247   : > { %v1015_v19 = vxor.u32 %v1013_v18, %v1012_v17  ;;  %v1014_v20 = vand.u32 %v1013_v18, %v1012_v17 }
0x1249   : > { %v1016_v21 = vshra.s32 %v1015_v19, 1 }
0x124b   : > { %v1017_v22 = vadd.s32 %v1016_v21, %v1014_v20 }
0x124d   : > { %vm1018_vm12 = vcmp.le.s32.totalorder %v1745_v4, %v1017_v22  ;;  %vm1019_vm13 = vcmp.le.s32.totalorder %v1749_v5, %v1017_v22  ;;  %v1038_v38 = vadd.s32 1, %v1017_v22 }
0x124e   : > { %v1020_v23 = vsel %vm1018_vm12, 1, %v1590_v6  ;;  %v1021_v24 = vsel %vm1019_vm13, 1, %v1590_v6  ;;  %vm1155_vm12 = vcmask 31744   ;;  %vm1243_vm13 = vcmask 64512  }
0x124f   : > { %v1022_v25 = vsel %vm244_vm2, %v1020_v23, 0  ;;  %v1023_v26 = vsel %vm244_vm2, %v1021_v24, 0 }
0x1250   : > { %v1024_v27 = vadd.s32 %v1023_v26, %v1022_v25 }
0x1252   : > { %v1026_v28 = vshrl.u32 %v1024_v27, 16  ;;  %v1025_v29 = vand.u32 65535, %v1024_v27 }
0x1254   : > { %v1028_v30 = vcvt.s32.f32 %v1026_v28  ;;  %v1027_v31 = vcvt.s32.f32 %v1025_v29 }
0x1256   : > { %1031 = vadd.xlane.f32.xlu0 %v1028_v30  ;;  %1029 = vadd.xlane.f32.xlu1 %v1027_v31 }
0x12e3   : > { %v1032_v32 = vpop.xlane.xlu0 %1031  ;;  %v1030_v33 = vpop.xlane.xlu1 %1029 }
0x12e4   : > { %v1034_v34 = vcvt.f32.s32 %v1032_v32  ;;  %v1033_v36 = vcvt.f32.s32 %v1030_v33 }
0x12e6   : > { %v1035_v35 = vshll.u32 %v1034_v34, 16 }
0x12e8   : > { %v1036_v37 = vadd.s32 %v1035_v35, %v1033_v36  ;;  %v1490_v36 = vld [vmem:[%s1734_s25] sm:$0xff]  ;;  %s1326_s25 = scalar_lea.sflag [#allocation4], %s1730_s13 }
0x12ea   : > { %vm1037_vm14 = vcmp.ge.s32.totalorder %v1036_v37, 128  ;;  %v245_v37 = vsel %vm244_vm2, %v1490_v36, 0.0 }
0x12eb   : > { %v1039_v39 = vsel %vm1037_vm14, %v1012_v17, %v1038_v38  ;;  %v1040_v40 = vsel %vm1037_vm14, %v1017_v22, %v1013_v18  ;;  %v246_v38 = vsel %vm244_vm2, %v1741_v1, 0.0  ;;  %vm1323_vm14 = vcmask 24576  }
0x12ec   : > { %v1042_v41 = vxor.u32 %v1040_v40, %v1039_v39  ;;  %v1041_v42 = vand.u32 %v1040_v40, %v1039_v39 }
0x12ee   : > { %v1043_v43 = vshra.s32 %v1042_v41, 1 }
0x12f0   : > { %v1044_v44 = vadd.s32 %v1043_v43, %v1041_v42  ;;  %v1147_v42 = vld [vmem:[%s2013_s1] sm:$0xf]  ;;  %v1592_v43 = vmov 0.0  }
0x12f1   : > { %1425 = vmatprep.subr.mxu0 %v1592_v43  ;;  %1427 = vmatprep.mubr.msk.f32.mxu0 %vm1593_vm8, %v1592_v43 }
0x12f2   : > { %vm1045_vm15 = vcmp.le.s32.totalorder %v1745_v4, %v1044_v44  ;;  %vm1046_vm0 = vcmp.le.s32.totalorder %v1749_v5, %v1044_v44  ;;  %v1065_v60 = vadd.s32 1, %v1044_v44  ;;  %1426 = vmatpush3.msk.msra.mxu0 %vm244_vm2, %v1147_v42  ;;  %1430 = vmatprep.subr.mxu1 %v1592_v43 }
0x12f3   : > { %v1047_v45 = vsel %vm1045_vm15, 1, %v1590_v6  ;;  %v1048_v46 = vsel %vm1046_vm0, 1, %v1590_v6  ;;  %1432 = vmatprep.mubr.msk.f32.mxu1 %vm1593_vm8, %v1592_v43 }
0x12f4   : > { %v1049_v47 = vsel %vm244_vm2, %v1047_v45, 0  ;;  %v1050_v48 = vsel %vm244_vm2, %v1048_v46, 0 }
0x12f5   : > { %v1051_v49 = vadd.s32 %v1050_v48, %v1049_v47 }
0x12f7   : > { %v1053_v50 = vshrl.u32 %v1051_v49, 16  ;;  %v1052_v51 = vand.u32 65535, %v1051_v49 }
0x12f9   : > { %v1055_v52 = vcvt.s32.f32 %v1053_v50  ;;  %v1054_v53 = vcvt.s32.f32 %v1052_v51 }
0x12fb   : > { %1058 = vadd.xlane.f32.xlu0 %v1055_v52  ;;  %1056 = vadd.xlane.f32.xlu1 %v1054_v53 }
0x1388   : > { %v1059_v54 = vpop.xlane.xlu0 %1058  ;;  %v1057_v55 = vpop.xlane.xlu1 %1056 }
0x1389   : > { %v1061_v56 = vcvt.f32.s32 %v1059_v54  ;;  %v1060_v58 = vcvt.f32.s32 %v1057_v55 }
0x138b   : > { %v1062_v57 = vshll.u32 %v1061_v56, 16 }
0x138d   : > { %v1063_v59 = vadd.s32 %v1062_v57, %v1060_v58 }
0x138f   : > { %vm1064_vm1 = vcmp.ge.s32.totalorder %v1063_v59, 128 }
0x1390   : > { %v1066_v61 = vsel %vm1064_vm1, %v1039_v39, %v1065_v60  ;;  %v1067_v62 = vsel %vm1064_vm1, %v1044_v44, %v1040_v40  ;;  %v247_v40 = vadd.f32 %v246_v38, %v245_v37 }
0x1391   : > { %v1069_v63 = vxor.u32 %v1067_v62, %v1066_v61  ;;  %v1068_v0 = vand.u32 %v1067_v62, %v1066_v61 }
0x1393   : > { %v1070_v2 = vshra.s32 %v1069_v63, 1 }
0x1395   : > { %v1071_v3 = vadd.s32 %v1070_v2, %v1068_v0  ;;  %v1240_v2 = vld [vmem:[%s2015_s3] sm:$0xff] }
0x1396   : > { %1431 = vmatpush3.msra.mxu1 %v1240_v2 }
0x1397   : > { %vm1072_vm3 = vcmp.le.s32.totalorder %v1745_v4, %v1071_v3  ;;  %vm1073_vm4 = vcmp.le.s32.totalorder %v1749_v5, %v1071_v3  ;;  %v1092_v22 = vadd.s32 1, %v1071_v3 }
0x1398   : > { %v1074_v7 = vsel %vm1072_vm3, 1, %v1590_v6  ;;  %v1075_v8 = vsel %vm1073_vm4, 1, %v1590_v6 }
0x1399   : > { %v1076_v9 = vsel %vm244_vm2, %v1074_v7, 0  ;;  %v1077_v10 = vsel %vm244_vm2, %v1075_v8, 0 }
0x139a   : > { %v1078_v11 = vadd.s32 %v1077_v10, %v1076_v9 }
0x139c   : > { %v1080_v12 = vshrl.u32 %v1078_v11, 16  ;;  %v1079_v13 = vand.u32 65535, %v1078_v11 }
0x139e   : > { %v1082_v14 = vcvt.s32.f32 %v1080_v12  ;;  %v1081_v15 = vcvt.s32.f32 %v1079_v13 }
0x13a0   : > { %1085 = vadd.xlane.f32.xlu0 %v1082_v14  ;;  %1083 = vadd.xlane.f32.xlu1 %v1081_v15  ;;  %v1241_v15 = vld [vmem:[%s2016_s4] sm:$0x1] }
0x142d   : > { %v1086_v16 = vpop.xlane.xlu0 %1085  ;;  %v1084_v17 = vpop.xlane.xlu1 %1083 }
0x142e   : > { %v1088_v18 = vcvt.f32.s32 %v1086_v16  ;;  %v1087_v20 = vcvt.f32.s32 %v1084_v17  ;;  %v1242_v16 = vmul.f32 3.0, %v1241_v15 }
0x1430   : > { %v1089_v19 = vshll.u32 %v1088_v18, 16 }
0x1432   : > { %v1090_v21 = vadd.s32 %v1089_v19, %v1087_v20 }
0x1434   : > { %vm1091_vm5 = vcmp.ge.s32.totalorder %v1090_v21, 128 }
0x1435   : > { %v1093_v23 = vsel %vm1091_vm5, %v1066_v61, %v1092_v22  ;;  %v1094_v24 = vsel %vm1091_vm5, %v1071_v3, %v1067_v62  ;;  %v1412_v3 = vld [vmem:[%s2014_s2] ss:$0 sm:$0xff] }
0x1436   : > { %v1096_v25 = vxor.u32 %v1094_v24, %v1093_v23  ;;  %v1095_v26 = vand.u32 %v1094_v24, %v1093_v23 }
0x1438   : > { %v1097_v27 = vshra.s32 %v1096_v25, 1 }
0x143a   : > { %v1098_v28 = vadd.s32 %v1097_v27, %v1095_v26 }
0x143c   : > { %vm1099_vm6 = vcmp.le.s32.totalorder %v1745_v4, %v1098_v28  ;;  %vm1100_vm7 = vcmp.le.s32.totalorder %v1749_v5, %v1098_v28  ;;  %v252_v4 = vsel %vm244_vm2, %v1490_v36, -inf  ;;  %v253_v5 = vsel %vm244_vm2, %v1741_v1, -inf }
0x143d   : > { %v1101_v29 = vsel %vm1099_vm6, 1, %v1590_v6  ;;  %v1102_v30 = vsel %vm1100_vm7, 1, %v1590_v6  ;;  %v254_v41 = vmax.f32 %v252_v4, %v253_v5  ;;  %v1125_v1 = vlaneseq }
0x143e   : > { %v1103_v31 = vsel %vm244_vm2, %v1101_v29, 0  ;;  %v1104_v32 = vsel %vm244_vm2, %v1102_v30, 0  ;;  %v1119_v56 = vadd.s32 1, %v1098_v28  ;;  %vm1143_vm2 = vcmask 1040384  }
0x143f   : > { %v1105_v33 = vadd.s32 %v1104_v32, %v1103_v31  ;;  %v1126_v44 = vand.u32 127, %v1125_v1  ;;  %v1128_v45 = vshrl.u32 %v1125_v1, 7 }
0x1441   : > { %v1107_v34 = vshrl.u32 %v1105_v33, 16  ;;  %v1106_v35 = vand.u32 65535, %v1105_v33  ;;  %v1129_v51 = vsub.s32 %v1126_v44, %v1128_v45 }
0x1443   : > { %v1109_v39 = vcvt.s32.f32 %v1107_v34  ;;  %v1108_v6 = vcvt.s32.f32 %v1106_v35 }
0x1445   : > { %1112 = vadd.xlane.f32.xlu0 %v1109_v39  ;;  %1110 = vadd.xlane.f32.xlu1 %v1108_v6 }
0x1449   : > { %248 = vadd.xlane.f32.xlu0 %v247_v40  ;;  %255 = vmax.xlane.f32.xlu1 %v254_v41 }
0x14d2   : > { %v1113_v46 = vpop.xlane.xlu0 %1112  ;;  %v1111_v47 = vpop.xlane.xlu1 %1110 }
0x14d3   : > { %v1115_v48 = vcvt.f32.s32 %v1113_v46  ;;  %v1114_v50 = vcvt.f32.s32 %v1111_v47 }
0x14d5   : > { %v1116_v49 = vshll.u32 %v1115_v48, 16 }
0x14d6   : > { %v249_v52 = vpop.xlane.xlu0 %248  ;;  %v256_v53 = vpop.xlane.xlu1 %255 }
0x14d7   : > { %v1117_v54 = vadd.s32 %v1116_v49, %v1114_v50  ;;  %v251_v55 = vmul.f32 0.00390625, %v249_v52  ;;  %v1136_v58 = vrot.slane %v256_v53, %v1129_v51 }
0x14d9   : > { %vm1118_vm9 = vcmp.ge.s32.totalorder %v1117_v54, 128  ;;  %v1130_v57 = vrot.slane %v251_v55, %v1129_v51 }
0x14da   : > { %v1120_v59 = vsel %vm1118_vm9, %v1093_v23, %v1119_v56 }
0x14db   : > { %vm1121_vm10 = vcmp.ge.s32.totalorder %v1120_v59, 0  ;;  %v1122_v60 = vxor.u32 2147483647, %v1120_v59  ;;  %v1144_v62 = vsel %vm1143_vm2, %v1130_v57, %v1136_v58 }
0x14dd   : > { %v1123_v61 = vsel %vm1121_vm10, %v1120_v59, %v1122_v60 }
0x14de   : > { %v1141_v63 = vrot.slane %v1123_v61, %v1129_v51 }
0x14e0   : > { %v1146_v0 = vsel %vm1145_vm11, %v1144_v62, %v1141_v63 }
0x14e1   : > { %1428 = vmatmul.mubr.msk.f32.vlgmr.msra.gmra.mrb[0].mxu0 %vm1155_vm12, %v1146_v0 }
0x15b4   : > { %v1228_v7 = vpop.f32.mrb[0].mxu0 }
0x15b5   : > { %v1229_v8 = vadd.f32 %v1412_v3, %v1228_v7  ;;  %v1429_v9 = vpop.f32.mrb[1].mxu0 }
0x15b7   : > { %v1232_v10 = vmax.f32 %v1229_v8, 0.0 }
0x15b9   : > { %v1234_v11 = vrot.slane %v1232_v10, 1  ;;  %v1237_v13 = vrot.slane %v1232_v10, 2 }
0x15bb   : > { %v1236_v12 = vadd.f32 %v1234_v11, %v1232_v10 }
0x15bd   : > { %v1239_v14 = vadd.f32 %v1237_v13, %v1236_v12 }
0x15bf   : > { %1433 = vmatmul.mubr.msk.f32.vlgmr.msra.gmra.mrb[0].mxu1 %vm1243_vm13, %v1239_v14 }
0x1692   : > { %v1313_v17 = vpop.f32.mrb[0].mxu1 }
0x1693   : > { %v1314_v18 = vadd.f32 %v1313_v17, %v1242_v16  ;;  %v1434_v19 = vpop.f32.mrb[1].mxu1 }
0x1695   : > { %v1416_v20 = vmul.f32 -1.442695, %v1314_v18 }
0x1697   : > { %1486 = vpow2.f32 %v1416_v20 }
0x16a1   : > { %v1487_v21 = vpop.eup %1486 }
0x16a2   : > { %v1320_v22 = vadd.f32 1.0, %v1487_v21 }
0x16a4   : > { %1488 = vrcp.f32 %v1320_v22 }
0x16ae   : > { %v1489_v23 = vpop.eup %1488 }
0x16af   : > { %1324 = vst.msk [vmem:[%s239_s9] sm:$0x1] %vm1323_vm14, %v1489_v23 }
0x16b0   : > { %1534 = shalt.err (!%p1531_p4)
}
0x16b1   : > { %s1535_s13 = scalar_lea.hbm %s1968_s23, 16  ;;  %s1539_s26 = scalar_lea.hbm %s2017_s5, 32 }
0x16b2   : > { %p1536_p5 = scmp.ne.s32.totalorder %s1968_s23, %s1535_s13  ;;  %p1540_p0 = scmp.lt.u32.totalorder %s1968_s23, %s2017_s5 }
0x16b3   : > { %p1541_p1 = scmp.lt.u32.totalorder %s1539_s26, %s1535_s13  ;;  %p1543_p6 = scmp.lt.u32.totalorder %s1535_s13, %s1968_s23 }
0x16b4   : > { %p1537_p8 = pnand %p1536_p5, %p2026_p11 }
0x16b5   : > { %p1542_p3 = por %p1541_p1, %p1540_p0 }
0x16b6   : > { %p1538_p9 = pneg %p1537_p8 }
0x16b7   : > { %p1544_p12 = por %p1543_p6, %p1542_p3 }
0x16b9   : > { %p1545_p13 = pnand %p1544_p12, %p1538_p9 }
0x16bb   : > { %1548 = shalt.err (!%p1545_p13)
}
0x16bc   : > { %1437 = dma.vmem_to_hbm [thread:$0]  (%p2026_p11), %s1970_s10, 16, %s1968_s23, %s1326_s25  }
0x16bd PF: > { %s1350_s7 = sand.u32 1, %s1575_s18   ;;  %p2027_p7 = scmp.ne.s32.totalorder %s2022_s6, 0 }
0x16be   : > { %p2028_p10 = scmp.ge.s32.totalorder %s1587_s21, 2  ;;  %s1351_s9 = scalar_lea.sflag [#allocation4], %s1350_s7 }
0x16c0   : > { %p1444_p2 = pnand %p2028_p10, %p2027_p7 }
0x16c2   : > { %1570 = dma.done.wait (!%p1444_p2), %s1351_s9, 16  }
0x16c3   : > { %1572 = vsyncadd (!%p1444_p2), %s1351_s9, 4294967280  ;;  %p18_p4 = scmp.ge.s32.totalorder %s1650_s24, 4   ;;  %s2029_s18 = smov %s1579_s19 }
0x16c4   : > { %s2030_s19 = smov %s1583_s20  ;;  %s2031_s20 = smov %s1662_s27 }
0x16c5   : > { %s2032_s21 = smov %s1650_s24  ;;  %20 = sbr.rel (!%p18_p4) target bundleno = 5 (0x5), region = 85 }
0x16cc   :  { %1355 = vsyncpa [#allocation3], 1 }
0x16cd   :  { %1357 = vsyncpa [#allocation3 + $0x1], 1 }
0x16ce   :  { %1358 = vsyncpa [#allocation4], 1 }
0x16cf   :  { %1360 = vsyncpa [#allocation4 + $0x1], 1 }

</bundles_post_ra>
